<compile_context>
chip_gen: v7x
topology: tpu7x:2x2x1
jax: 0.10.0
libtpu: 0.0.40
codegen_flags: <defaults>
</compile_context>

<pallas_src>
import functools

import jax
import jax.numpy as jnp
from jax import lax
from jax.experimental import pallas as pl
from jax.experimental.pallas import tpu as pltpu

# ----------------------------------------------------------------------------
# Small deterministic stand-ins for the original FLAGS / layer widths
# ----------------------------------------------------------------------------
CLIP_R_DIM = 32        # FLAGS.clip_r_dim   (1280 in the original)
CLIP_T_DIM = 48        # FLAGS.clip_t_dim   (1920 in the original)
OBJ_C = 6              # FLAGS.obj_c
RECON_NUM = 3
FACE_RECON_C = 6       # FLAGS.face_recon_c
H1, H2, H3 = 64, 64, 32        # 512, 512, 256 in the original conv1d_block
RH = 16                        # 128 in the original recon head
F1, F2, F3 = 64, 48, 32        # 1024, 512, 256 in the original face head
BN_EPS = 1e-5
LANE = 128


def _rpad(n):
    return ((n + LANE - 1) // LANE) * LANE


# ----------------------------------------------------------------------------
# Generation-aware knobs
# ----------------------------------------------------------------------------
@functools.lru_cache(maxsize=None)
def _vmem_limit_bytes():
    # ~75% of physical VMEM, capped at 96 MiB:
    #   v5e/v6e (128 MiB) -> 96 MiB,  v7x (64 MiB) -> 48 MiB.
    try:
        cap = int(pltpu.get_tpu_info().vmem_capacity_bytes)
        return int(min(cap * 3 // 4, 96 * 1024 * 1024))
    except Exception:
        return None                      # unknown -> keep compiler default


def _mosaic_params():
    lim = _vmem_limit_bytes()
    kw = {} if lim is None else {"vmem_limit_bytes": lim}
    # M-tile axis is fully independent across tiles -> megacore "parallel".
    return pltpu.CompilerParams(dimension_semantics=("parallel",), **kw)


def _choose_tm(m):
    # Prefer 256-row multiples (bf16 MXU granule on v6e/v7x); allow bigger
    # tiles when the part has 128 MiB VMEM.
    cap = _vmem_limit_bytes()
    if cap is not None and cap > (64 << 20):
        tiles = (1024, 512, 256, 128, 64, 32, 16, 8)
    else:
        tiles = (512, 256, 128, 64, 32, 16, 8)
    for tm in tiles:
        if m % tm == 0:
            return tm
    return m                              # ragged fallback: single full-M block


# ----------------------------------------------------------------------------
# In-kernel helpers
# ----------------------------------------------------------------------------
def _mm(a16, w_ref):
    return jnp.dot(a16, w_ref[...], preferred_element_type=jnp.float32)


def _norm_relu(p_ref, sc_ref, sh_ref):
    # BatchNorm (mean folded into shift outside the kernel) + ReLU, bf16 out.
    y = p_ref[...].astype(jnp.float32)
    a = jnp.maximum(y * sc_ref[...] + sh_ref[...], 0.0)
    return a.astype(jnp.bfloat16)


def _emit(y_f32, y_ref, s_ref):
    # Stage the pre-activation in bf16 and emit per-tile BN partial sums
    # (stats computed from the exact staged/rounded values).
    y16 = y_f32.astype(jnp.bfloat16)
    y_ref[...] = y16
    yf = y16.astype(jnp.float32)
    c = yf.shape[1]
    ssum = jnp.sum(yf, axis=0, keepdims=True)          # (1, C)
    ssq = jnp.sum(yf * yf, axis=0, keepdims=True)      # (1, C)
    rows = lax.broadcasted_iota(jnp.int32, (8, c), 0)
    blk = jnp.where(rows == 0, jnp.broadcast_to(ssum, (8, c)),
                    jnp.where(rows == 1, jnp.broadcast_to(ssq, (8, c)), 0.0))
    s_ref[...] = blk[None]                              # (1, 8, C)


# ----------------------------------------------------------------------------
# Phase kernels (each handles BOTH branches)
# ----------------------------------------------------------------------------
def _phase_in_kernel(xR, xT, wR, wT, yR, yT, sR, sT):
    # conv-block layer 0: pre-act = x @ W (conv bias cancelled by BN).
    _emit(_mm(xR[...], wR), yR, sR)
    _emit(_mm(xT[...], wT), yT, sT)


def _phase_mid_kernel(pR, scR, shR, wR, pT, scT, shT, wT, yR, yT, sR, sT):
    # generic BN -> ReLU -> matmul layer.
    _emit(_mm(_norm_relu(pR, scR, shR), wR), yR, sR)
    _emit(_mm(_norm_relu(pT, scT, shT), wT), yT, sT)


def _phase_split_kernel(y2R, scR, shR, wrR, xR, wfxR, wfhR,
                        y2T, scT, shT, wrT, xT, wfxT, wfhT,
                        yrR, srR, yfR, sfR, yrT, srT, yfT, sfT):
    # conv-block output h feeds BOTH heads; face-head layer 0 acts on
    # concat([feat|one_hot|vertices, h]) via split weights (no concat).
    for (y2, sc, sh, wr, x, wfx, wfh, yr_o, sr_o, yf_o, sf_o) in (
            (y2R, scR, shR, wrR, xR, wfxR, wfhR, yrR, srR, yfR, sfR),
            (y2T, scT, shT, wrT, xT, wfxT, wfhT, yrT, srT, yfT, sfT)):
        h = _norm_relu(y2, sc, sh)
        _emit(_mm(h, wr), yr_o, sr_o)                       # recon head conv0
        _emit(_mm(x[...], wfx) + _mm(h, wfh), yf_o, sf_o)   # face head conv0


def _phase_out_kernel(yrR, scrR, shrR, wroR, yfR, scfR, shfR, wfoR,
                      yrT, scrT, shrT, wroT, yfT, scfT, shfT, wfoT,
                      bias, out_ref):
    # Final convs of both heads, both branches; output columns are pre-packed
    # into disjoint lanes (recon -> [0:3), face -> [3:9)), so a plain sum +
    # 0.5 scale gives the averaged, packed (TM, 128) tile.
    acc = _mm(_norm_relu(yrR, scrR, shrR), wroR)
    acc = acc + _mm(_norm_relu(yfR, scfR, shfR), wfoR)
    acc = acc + _mm(_norm_relu(yrT, scrT, shrT), wroT)
    acc = acc + _mm(_norm_relu(yfT, scfT, shfT), wfoT)
    out_ref[...] = 0.5 * acc + bias[...]


# ----------------------------------------------------------------------------
# BlockSpec / pallas_call plumbing
# ----------------------------------------------------------------------------
def _act_spec(tm, c):
    return pl.BlockSpec((tm, c), lambda m: (m, 0))


def _inv_spec(arr):
    # Grid-invariant (weights / BN vectors): fetched once, block index fixed.
    shape = arr.shape
    return pl.BlockSpec(shape, lambda m: (0,) * len(shape))


def _y_out(m, tm, c):
    return jax.ShapeDtypeStruct((m, c), jnp.bfloat16), _act_spec(tm, c)


def _s_out(n_m, c):
    return (jax.ShapeDtypeStruct((n_m, 8, c), jnp.float32),
            pl.BlockSpec((1, 8, c), lambda m: (m, 0, 0)))


def _run_in(xR, xT, wR, wT, tm, n_m):
    m = xR.shape[0]
    cout = wR.shape[1]
    y_sh, y_sp = _y_out(m, tm, cout)
    s_sh, s_sp = _s_out(n_m, cout)
    return pl.pallas_call(
        _phase_in_kernel, grid=(n_m,),
        in_specs=[_act_spec(tm, xR.shape[1]), _act_spec(tm, xT.shape[1]),
                  _inv_spec(wR), _inv_spec(wT)],
        out_specs=(y_sp, y_sp, s_sp, s_sp),
        out_shape=(y_sh, y_sh, s_sh, s_sh),
        compiler_params=_mosaic_params(),
    )(xR, xT, wR, wT)


def _run_mid(prevR, prevT, bnR, bnT, wR, wT, tm, n_m):
    m = prevR.shape[0]
    cout = wR.shape[1]
    y_sh, y_sp = _y_out(m, tm, cout)
    s_sh, s_sp = _s_out(n_m, cout)
    return pl.pallas_call(
        _phase_mid_kernel, grid=(n_m,),
        in_specs=[_act_spec(tm, prevR.shape[1]), _inv_spec(bnR[0]),
                  _inv_spec(bnR[1]), _inv_spec(wR),
                  _act_spec(tm, prevT.shape[1]), _inv_spec(bnT[0]),
                  _inv_spec(bnT[1]), _inv_spec(wT)],
        out_specs=(y_sp, y_sp, s_sp, s_sp),
        out_shape=(y_sh, y_sh, s_sh, s_sh),
        compiler_params=_mosaic_params(),
    )(prevR, bnR[0], bnR[1], wR, prevT, bnT[0], bnT[1], wT)


def _run_split(y2R, bn2R, wrR, xR, wf0xR, wf0hR,
               y2T, bn2T, wrT, xT, wf0xT, wf0hT, tm, n_m):
    m = y2R.shape[0]
    rhp, f1p = wrR.shape[1], wf0hR.shape[1]
    yr_sh, yr_sp = _y_out(m, tm, rhp)
    yf_sh, yf_sp = _y_out(m, tm, f1p)
    sr_sh, sr_sp = _s_out(n_m, rhp)
    sf_sh, sf_sp = _s_out(n_m, f1p)
    in_specs = [_act_spec(tm, y2R.shape[1]), _inv_spec(bn2R[0]),
                _inv_spec(bn2R[1]), _inv_spec(wrR),
                _act_spec(tm, xR.shape[1]), _inv_spec(wf0xR), _inv_spec(wf0hR),
                _act_spec(tm, y2T.shape[1]), _inv_spec(bn2T[0]),
                _inv_spec(bn2T[1]), _inv_spec(wrT),
                _act_spec(tm, xT.shape[1]), _inv_spec(wf0xT), _inv_spec(wf0hT)]
    return pl.pallas_call(
        _phase_split_kernel, grid=(n_m,),
        in_specs=in_specs,
        out_specs=(yr_sp, sr_sp, yf_sp, sf_sp, yr_sp, sr_sp, yf_sp, sf_sp),
        out_shape=(yr_sh, sr_sh, yf_sh, sf_sh, yr_sh, sr_sh, yf_sh, sf_sh),
        compiler_params=_mosaic_params(),
    )(y2R, bn2R[0], bn2R[1], wrR, xR, wf0xR, wf0hR,
      y2T, bn2T[0], bn2T[1], wrT, xT, wf0xT, wf0hT)


def _run_out(yrR, bnrR, wroR, yfR, bnfR, wfoR,
             yrT, bnrT, wroT, yfT, bnfT, wfoT, bias, tm, n_m):
    m = yrR.shape[0]
    out_sh = jax.ShapeDtypeStruct((m, LANE), jnp.float32)
    out_sp = _act_spec(tm, LANE)
    in_specs = [_act_spec(tm, yrR.shape[1]), _inv_spec(bnrR[0]),
                _inv_spec(bnrR[1]), _inv_spec(wroR),
                _act_spec(tm, yfR.shape[1]), _inv_spec(bnfR[0]),
                _inv_spec(bnfR[1]), _inv_spec(wfoR),
                _act_spec(tm, yrT.shape[1]), _inv_spec(bnrT[0]),
                _inv_spec(bnrT[1]), _inv_spec(wroT),
                _act_spec(tm, yfT.shape[1]), _inv_spec(bnfT[0]),
                _inv_spec(bnfT[1]), _inv_spec(wfoT),
                _inv_spec(bias)]
    return pl.pallas_call(
        _phase_out_kernel, grid=(n_m,),
        in_specs=in_specs, out_specs=out_sp, out_shape=out_sh,
        compiler_params=_mosaic_params(),
    )(yrR, bnrR[0], bnrR[1], wroR, yfR, bnfR[0], bnfR[1], wfoR,
      yrT, bnrT[0], bnrT[1], wroT, yfT, bnfT[0], bnfT[1], wfoT, bias)


def _bn_fold(stats, gamma, beta, m_total):
    # Fold batch stats into (scale, shift): y*scale + shift  (mean folded in).
    ssum = jnp.sum(stats[:, 0, :], axis=0)
    ssq = jnp.sum(stats[:, 1, :], axis=0)
    mean = ssum / m_total
    var = jnp.maximum(ssq / m_total - mean * mean, 0.0)
    scale = gamma * lax.rsqrt(var + BN_EPS)        # gamma zero-padded -> 0
    shift = beta - mean * scale
    return scale, shift


# ----------------------------------------------------------------------------
# Deterministic parameter construction (shapes mirror the nn.Module __init__)
# ----------------------------------------------------------------------------
def _make_branch_raw(key, clip_dim):
    cin = clip_dim + OBJ_C
    ks = jax.random.split(key, 9)

    def cbr(k, ci, co):
        k1, k2, k3 = jax.random.split(k, 3)
        return (0.05 * jax.random.normal(k1, (ci, co), jnp.float32),
                1.0 + 0.1 * jax.random.normal(k2, (co,), jnp.float32),
                0.1 * jax.random.normal(k3, (co,), jnp.float32))

    def conv(k, ci, co):
        k1, k2 = jax.random.split(k, 2)
        return (0.05 * jax.random.normal(k1, (ci, co), jnp.float32),
                0.05 * jax.random.normal(k2, (co,), jnp.float32))

    raw = {"cin": cin}
    raw["w0"], raw["g0"], raw["b0"] = cbr(ks[0], cin, H1)
    raw["w1"], raw["g1"], raw["b1"] = cbr(ks[1], H1, H2)
    raw["w2"], raw["g2"], raw["b2"] = cbr(ks[2], H2, H3)
    raw["wr"], raw["gr"], raw["br"] = cbr(ks[3], H3, RH)
    raw["wro"], raw["bro"] = conv(ks[4], RH, RECON_NUM)
    face_in = cin + H3 + 3
    raw["wf0"], raw["gf0"], raw["bf0"] = cbr(ks[5], face_in, F1)
    raw["wf1"], raw["gf1"], raw["bf1"] = cbr(ks[6], F1, F2)
    raw["wf2"], raw["gf2"], raw["bf2"] = cbr(ks[7], F2, F3)
    raw["wfo"], raw["bfo"] = conv(ks[8], F3, FACE_RECON_C)
    return raw


def _pad_mat(w, rp, cp, c0=0):
    out = jnp.zeros((rp, cp), jnp.float32)
    out = out.at[:w.shape[0], c0:c0 + w.shape[1]].set(w)
    return out.astype(jnp.bfloat16)


def _pad_vec(v, cp, c0=0):
    out = jnp.zeros((1, cp), jnp.float32)
    return out.at[0, c0:c0 + v.shape[0]].set(v)


def _pad_branch(raw):
    cin = raw["cin"]
    cxp = _rpad(cin + 3)                 # x layout: [feat|one_hot|xyz|0-pad]
    h1p, h2p, h3p = _rpad(H1), _rpad(H2), _rpad(H3)
    rhp = _rpad(RH)
    f1p, f2p, f3p = _rpad(F1), _rpad(F2), _rpad(F3)
    p = {}
    p["w0"] = _pad_mat(raw["w0"], cxp, h1p)      # vertex lanes get zero rows
    p["g0"], p["b0"] = _pad_vec(raw["g0"], h1p), _pad_vec(raw["b0"], h1p)
    p["w1"] = _pad_mat(raw["w1"], h1p, h2p)
    p["g1"], p["b1"] = _pad_vec(raw["g1"], h2p), _pad_vec(raw["b1"], h2p)
    p["w2"] = _pad_mat(raw["w2"], h2p, h3p)
    p["g2"], p["b2"] = _pad_vec(raw["g2"], h3p), _pad_vec(raw["b2"], h3p)
    p["wr"] = _pad_mat(raw["wr"], h3p, rhp)
    p["gr"], p["br"] = _pad_vec(raw["gr"], rhp), _pad_vec(raw["br"], rhp)
    # final recon conv packed at lanes [0:3) of the shared output tile
    p["wro"] = _pad_mat(raw["wro"], rhp, LANE, c0=0)
    p["bro"] = _pad_vec(raw["bro"], LANE, c0=0)
    # face-head conv0 weight split by source; vertex rows folded into the
    # x-path weight at the x lanes where the coordinates live (cin..cin+2).
    wf0 = raw["wf0"]
    wf0_x = jnp.concatenate([wf0[:cin], wf0[cin + H3:cin + H3 + 3]], axis=0)
    wf0_h = wf0[cin:cin + H3]
    p["wf0x"] = _pad_mat(wf0_x, cxp, f1p)
    p["wf0h"] = _pad_mat(wf0_h, h3p, f1p)
    p["gf0"], p["bf0"] = _pad_vec(raw["gf0"], f1p), _pad_vec(raw["bf0"], f1p)
    p["wf1"] = _pad_mat(raw["wf1"], f1p, f2p)
    p["gf1"], p["bf1"] = _pad_vec(raw["gf1"], f2p), _pad_vec(raw["bf1"], f2p)
    p["wf2"] = _pad_mat(raw["wf2"], f2p, f3p)
    p["gf2"], p["bf2"] = _pad_vec(raw["gf2"], f3p), _pad_vec(raw["bf2"], f3p)
    # final face conv packed at lanes [3:9) of the shared output tile
    p["wfo"] = _pad_mat(raw["wfo"], f3p, LANE, c0=RECON_NUM)
    p["bfo"] = _pad_vec(raw["bfo"], LANE, c0=RECON_NUM)
    return p


def make_params(key):
    kr, kt = jax.random.split(key, 2)
    raw = {"R": _make_branch_raw(kr, CLIP_R_DIM),
           "t": _make_branch_raw(kt, CLIP_T_DIM)}
    padded = {b: _pad_branch(r) for b, r in raw.items()}
    return raw, padded


# ----------------------------------------------------------------------------
# Forward pass (FLAGS.train == True branch)
# ----------------------------------------------------------------------------
def face_recon_forward(params, vertices, cat_id, clip_r_feat, clip_t_feat):
    pR, pT = params["R"], params["t"]
    bs, vn, _ = vertices.shape
    M = bs * vn
    TM = _choose_tm(M)
    n_m = M // TM

    one_hot = jax.nn.one_hot(cat_id[:, 0].astype(jnp.int32), OBJ_C,
                             dtype=jnp.float32)
    one_hot = jnp.broadcast_to(one_hot[:, None, :], (bs, vn, OBJ_C))
    one_hot = one_hot.reshape(M, OBJ_C)
    v = vertices.reshape(M, 3).astype(jnp.float32)

    def prep(feat):
        # [clip_feat | one_hot | vertices | zero-pad] -> bf16 lane-dense rows.
        x = jnp.concatenate([feat.reshape(M, -1), one_hot, v], axis=1)
        c = x.shape[1]
        return jnp.pad(x, ((0, 0), (0, _rpad(c) - c))).astype(jnp.bfloat16)

    xR, xT = prep(clip_r_feat), prep(clip_t_feat)

    # phase 0: conv-block layer 0
    y0R, y0T, s0R, s0T = _run_in(xR, xT, pR["w0"], pT["w0"], TM, n_m)
    bn0R = _bn_fold(s0R, pR["g0"], pR["b0"], M)
    bn0T = _bn_fold(s0T, pT["g0"], pT["b0"], M)
    # phases 1-2: conv-block layers 1, 2
    y1R, y1T, s1R, s1T = _run_mid(y0R, y0T, bn0R, bn0T, pR["w1"], pT["w1"],
                                  TM, n_m)
    bn1R = _bn_fold(s1R, pR["g1"], pR["b1"], M)
    bn1T = _bn_fold(s1T, pT["g1"], pT["b1"], M)
    y2R, y2T, s2R, s2T = _run_mid(y1R, y1T, bn1R, bn1T, pR["w2"], pT["w2"],
                                  TM, n_m)
    bn2R = _bn_fold(s2R, pR["g2"], pR["b2"], M)
    bn2T = _bn_fold(s2T, pT["g2"], pT["b2"], M)
    # phase 3: recon-head conv0 + face-head conv0 (concat-free)
    (yrR, srR, yfR, sfR, yrT, srT, yfT, sfT) = _run_split(
        y2R, bn2R, pR["wr"], xR, pR["wf0x"], pR["wf0h"],
        y2T, bn2T, pT["wr"], xT, pT["wf0x"], pT["wf0h"], TM, n_m)
    bnrR = _bn_fold(srR, pR["gr"], pR["br"], M)
    bnrT = _bn_fold(srT, pT["gr"], pT["br"], M)
    bnf0R = _bn_fold(sfR, pR["gf0"], pR["bf0"], M)
    bnf0T = _bn_fold(sfT, pT["gf0"], pT["bf0"], M)
    # phases 4-5: face-head convs 1, 2
    yf1R, yf1T, sf1R, sf1T = _run_mid(yfR, yfT, bnf0R, bnf0T,
                                      pR["wf1"], pT["wf1"], TM, n_m)
    bnf1R = _bn_fold(sf1R, pR["gf1"], pR["bf1"], M)
    bnf1T = _bn_fold(sf1T, pT["gf1"], pT["bf1"], M)
    yf2R, yf2T, sf2R, sf2T = _run_mid(yf1R, yf1T, bnf1R, bnf1T,
                                      pR["wf2"], pT["wf2"], TM, n_m)
    bnf2R = _bn_fold(sf2R, pR["gf2"], pR["bf2"], M)
    bnf2T = _bn_fold(sf2T, pT["gf2"], pT["bf2"], M)
    # final phase: both head output convs, R/t average, single packed output
    bias = 0.5 * (pR["bro"] + pR["bfo"] + pT["bro"] + pT["bfo"])
    out = _run_out(yrR, bnrR, pR["wro"], yf2R, bnf2R, pR["wfo"],
                   yrT, bnrT, pT["wro"], yf2T, bnf2T, pT["wfo"],
                   bias, TM, n_m)
    recon = out[:, :RECON_NUM].reshape(bs, vn, RECON_NUM)
    face = out[:, RECON_NUM:RECON_NUM + FACE_RECON_C].reshape(
        bs, vn, FACE_RECON_C)
    return recon, face


# ----------------------------------------------------------------------------
# Pure-JAX f32 reference (exact training-mode BN, two-pass variance)
# ----------------------------------------------------------------------------
def reference_forward(raw, vertices, cat_id, clip_r_feat, clip_t_feat):
    bs, vn, _ = vertices.shape
    M = bs * vn
    one_hot = jax.nn.one_hot(cat_id[:, 0].astype(jnp.int32), OBJ_C,
                             dtype=jnp.float32)
    one_hot = jnp.broadcast_to(one_hot[:, None, :], (bs, vn, OBJ_C))
    one_hot = one_hot.reshape(M, OBJ_C)
    v = vertices.reshape(M, 3).astype(jnp.float32)

    def bn_relu(y, g, b):
        mean = jnp.mean(y, axis=0, keepdims=True)
        var = jnp.mean((y - mean) ** 2, axis=0, keepdims=True)
        return jnp.maximum((y - mean) * (g / jnp.sqrt(var + BN_EPS)) + b, 0.0)

    def branch(p, feat):
        x = jnp.concatenate([feat.reshape(M, -1), one_hot], axis=1)
        h = bn_relu(x @ p["w0"], p["g0"], p["b0"])
        h = bn_relu(h @ p["w1"], p["g1"], p["b1"])
        h = bn_relu(h @ p["w2"], p["g2"], p["b2"])
        r = bn_relu(h @ p["wr"], p["gr"], p["br"])
        recon = r @ p["wro"] + p["bro"]
        fin = jnp.concatenate([x, h, v], axis=1)
        f = bn_relu(fin @ p["wf0"], p["gf0"], p["bf0"])
        f = bn_relu(f @ p["wf1"], p["gf1"], p["bf1"])
        f = bn_relu(f @ p["wf2"], p["gf2"], p["bf2"])
        face = f @ p["wfo"] + p["bfo"]
        return recon, face

    rR, fR = branch(raw["R"], clip_r_feat)
    rT, fT = branch(raw["t"], clip_t_feat)
    recon = 0.5 * (rR + rT)
    face = 0.5 * (fR + fT)
    return (recon.reshape(bs, vn, RECON_NUM),
            face.reshape(bs, vn, FACE_RECON_C))


# ----------------------------------------------------------------------------
if __name__ == "__main__":
    key = jax.random.PRNGKey(0)
    k_param, k_v, k_c, k_r, k_t = jax.random.split(key, 5)

    bs, vertice_num = 2, 16
    raw_params, padded_params = make_params(k_param)

    vertices = jax.random.normal(k_v, (bs, vertice_num, 3), jnp.float32)
    cat_id = jax.random.randint(k_c, (bs, 1), 0, OBJ_C, jnp.int32)
    clip_r_feat = jax.random.normal(k_r, (bs, vertice_num, CLIP_R_DIM),
                                    jnp.float32)
    clip_t_feat = jax.random.normal(k_t, (bs, vertice_num, CLIP_T_DIM),
                                    jnp.float32)

    fwd = jax.jit(face_recon_forward)
    recon, face = fwd(padded_params, vertices, cat_id, clip_r_feat,
                      clip_t_feat)
    jax.block_until_ready((recon, face))

    assert recon.shape == (bs, vertice_num, RECON_NUM)
    assert face.shape == (bs, vertice_num, FACE_RECON_C)
    assert bool(jnp.all(jnp.isfinite(recon)))
    assert bool(jnp.all(jnp.isfinite(face)))

    # bf16 MXU path vs f32 reference (matmuls/activations in bf16 -> loose tol)
    recon_ref, face_ref = reference_forward(raw_params, vertices, cat_id,
                                            clip_r_feat, clip_t_feat)
    err_r = float(jnp.max(jnp.abs(recon - recon_ref)))
    err_f = float(jnp.max(jnp.abs(face - face_ref)))
    assert err_r < 0.08 and err_f < 0.08, (err_r, err_f)

    print("KERNEL_OK")
</pallas_src>

<mosaic_0001>
module attributes {stable_mosaic.version = 11 : i64} {
  func.func @_phase_in_kernel(%arg0: i32, %arg1: memref<32x128xbf16, #tpu.memory_space<vmem>>, %arg2: memref<32x128xbf16, #tpu.memory_space<vmem>>, %arg3: memref<128x128xbf16, #tpu.memory_space<vmem>>, %arg4: memref<128x128xbf16, #tpu.memory_space<vmem>>, %arg5: memref<32x128xbf16, #tpu.memory_space<vmem>>, %arg6: memref<32x128xbf16, #tpu.memory_space<vmem>>, %arg7: memref<1x8x128xf32, #tpu.memory_space<vmem>>, %arg8: memref<1x8x128xf32, #tpu.memory_space<vmem>>) attributes {dimension_semantics = [#tpu.dimension_semantics<parallel>], iteration_bounds = array<i64: 1>, scalar_prefetch = 0 : i64, scratch_operands = 0 : i64, tpu.core_type = #tpu.core_type<tc>, window_params = [{transform_indices = @transform_0, window_bounds = array<i64: 32, 128>}, {transform_indices = @transform_1, window_bounds = array<i64: 32, 128>}, {pipeline_mode = #tpu.pipeline_mode<synchronous>, transform_indices = @transform_2, window_bounds = array<i64: 128, 128>}, {pipeline_mode = #tpu.pipeline_mode<synchronous>, transform_indices = @transform_3, window_bounds = array<i64: 128, 128>}, {transform_indices = @transform_4, window_bounds = array<i64: 32, 128>}, {transform_indices = @transform_5, window_bounds = array<i64: 32, 128>}, {transform_indices = @transform_6, window_bounds = array<i64: 1, 8, 128>}, {transform_indices = @transform_7, window_bounds = array<i64: 1, 8, 128>}]} {
    %c0 = arith.constant 0 : index
    %c0_0 = arith.constant 0 : index
    %0 = vector.load %arg1[%c0, %c0_0] : memref<32x128xbf16, #tpu.memory_space<vmem>>, vector<32x128xbf16>
    %c0_1 = arith.constant 0 : index
    %c0_2 = arith.constant 0 : index
    %1 = vector.load %arg3[%c0_1, %c0_2] : memref<128x128xbf16, #tpu.memory_space<vmem>>, vector<128x128xbf16>
    %cst = arith.constant dense<0.000000e+00> : vector<32x128xf32>
    %2 = tpu.matmul %0, %1, %cst {dimension_numbers = #tpu.dot_dimension_numbers<[1], [0], [0], [1], [0, 0, 1, 1], [], []>} : vector<32x128xbf16>, vector<128x128xbf16>, vector<32x128xf32> -> vector<32x128xf32>
    %3 = arith.truncf %2 : vector<32x128xf32> to vector<32x128xbf16>
    %c0_3 = arith.constant 0 : index
    %c0_4 = arith.constant 0 : index
    %4 = vector.load %arg5[%c0_3, %c0_4] : memref<32x128xbf16, #tpu.memory_space<vmem>>, vector<32x128xbf16>
    tpu.vector_store %arg5[%c0_3, %c0_4], %3 {strides = array<i32>} : memref<32x128xbf16, #tpu.memory_space<vmem>>, vector<32x128xbf16>,
    %5 = arith.extf %3 : vector<32x128xbf16> to vector<32x128xf32>
    %cst_5 = arith.constant dense<0.000000e+00> : vector<128xf32>
    %6 = vector.multi_reduction <add>, %5, %cst_5 [0] : vector<32x128xf32> to vector<128xf32>
    %7 = vector.shape_cast %6 : vector<128xf32> to vector<1x128xf32>
    %8 = arith.mulf %5, %5 : vector<32x128xf32>
    %cst_6 = arith.constant dense<0.000000e+00> : vector<128xf32>
    %9 = vector.multi_reduction <add>, %8, %cst_6 [0] : vector<32x128xf32> to vector<128xf32>
    %10 = vector.shape_cast %9 : vector<128xf32> to vector<1x128xf32>
    %11 = tpu.iota {dimensions = array<i32: 0>} : vector<8x128xi32>
    %c0_i32 = arith.constant 0 : i32
    %12 = vector.broadcast %c0_i32 : i32 to vector<8x128xi32>
    %13 = arith.cmpi eq, %11, %12 : vector<8x128xi32>
    %14 = vector.shape_cast %7 : vector<1x128xf32> to vector<1x128xf32>
    %15 = vector.broadcast %14 : vector<1x128xf32> to vector<8x128xf32>
    %c1_i32 = arith.constant 1 : i32
    %16 = vector.broadcast %c1_i32 : i32 to vector<8x128xi32>
    %17 = arith.cmpi eq, %11, %16 : vector<8x128xi32>
    %18 = vector.shape_cast %10 : vector<1x128xf32> to vector<1x128xf32>
    %19 = vector.broadcast %18 : vector<1x128xf32> to vector<8x128xf32>
    %cst_7 = arith.constant 0.000000e+00 : f32
    %20 = vector.broadcast %cst_7 : f32 to vector<8x128xf32>
    %21 = arith.select %17, %19, %20 : vector<8x128xi1>, vector<8x128xf32>
    %22 = arith.select %13, %15, %21 : vector<8x128xi1>, vector<8x128xf32>
    %23 = vector.shape_cast %22 : vector<8x128xf32> to vector<1x8x128xf32>
    %c0_8 = arith.constant 0 : index
    %c0_9 = arith.constant 0 : index
    %c0_10 = arith.constant 0 : index
    %24 = vector.load %arg7[%c0_8, %c0_9, %c0_10] : memref<1x8x128xf32, #tpu.memory_space<vmem>>, vector<1x8x128xf32>
    tpu.vector_store %arg7[%c0_8, %c0_9, %c0_10], %23 {strides = array<i32>} : memref<1x8x128xf32, #tpu.memory_space<vmem>>, vector<1x8x128xf32>,
    %c0_11 = arith.constant 0 : index
    %c0_12 = arith.constant 0 : index
    %25 = vector.load %arg2[%c0_11, %c0_12] : memref<32x128xbf16, #tpu.memory_space<vmem>>, vector<32x128xbf16>
    %c0_13 = arith.constant 0 : index
    %c0_14 = arith.constant 0 : index
    %26 = vector.load %arg4[%c0_13, %c0_14] : memref<128x128xbf16, #tpu.memory_space<vmem>>, vector<128x128xbf16>
    %cst_15 = arith.constant dense<0.000000e+00> : vector<32x128xf32>
    %27 = tpu.matmul %25, %26, %cst_15 {dimension_numbers = #tpu.dot_dimension_numbers<[1], [0], [0], [1], [0, 0, 1, 1], [], []>} : vector<32x128xbf16>, vector<128x128xbf16>, vector<32x128xf32> -> vector<32x128xf32>
    %28 = arith.truncf %27 : vector<32x128xf32> to vector<32x128xbf16>
    %c0_16 = arith.constant 0 : index
    %c0_17 = arith.constant 0 : index
    %29 = vector.load %arg6[%c0_16, %c0_17] : memref<32x128xbf16, #tpu.memory_space<vmem>>, vector<32x128xbf16>
    tpu.vector_store %arg6[%c0_16, %c0_17], %28 {strides = array<i32>} : memref<32x128xbf16, #tpu.memory_space<vmem>>, vector<32x128xbf16>,
    %30 = arith.extf %28 : vector<32x128xbf16> to vector<32x128xf32>
    %cst_18 = arith.constant dense<0.000000e+00> : vector<128xf32>
    %31 = vector.multi_reduction <add>, %30, %cst_18 [0] : vector<32x128xf32> to vector<128xf32>
    %32 = vector.shape_cast %31 : vector<128xf32> to vector<1x128xf32>
    %33 = arith.mulf %30, %30 : vector<32x128xf32>
    %cst_19 = arith.constant dense<0.000000e+00> : vector<128xf32>
    %34 = vector.multi_reduction <add>, %33, %cst_19 [0] : vector<32x128xf32> to vector<128xf32>
    %35 = vector.shape_cast %34 : vector<128xf32> to vector<1x128xf32>
    %36 = tpu.iota {dimensions = array<i32: 0>} : vector<8x128xi32>
    %c0_i32_20 = arith.constant 0 : i32
    %37 = vector.broadcast %c0_i32_20 : i32 to vector<8x128xi32>
    %38 = arith.cmpi eq, %36, %37 : vector<8x128xi32>
    %39 = vector.shape_cast %32 : vector<1x128xf32> to vector<1x128xf32>
    %40 = vector.broadcast %39 : vector<1x128xf32> to vector<8x128xf32>
    %c1_i32_21 = arith.constant 1 : i32
    %41 = vector.broadcast %c1_i32_21 : i32 to vector<8x128xi32>
    %42 = arith.cmpi eq, %36, %41 : vector<8x128xi32>
    %43 = vector.shape_cast %35 : vector<1x128xf32> to vector<1x128xf32>
    %44 = vector.broadcast %43 : vector<1x128xf32> to vector<8x128xf32>
    %cst_22 = arith.constant 0.000000e+00 : f32
    %45 = vector.broadcast %cst_22 : f32 to vector<8x128xf32>
    %46 = arith.select %42, %44, %45 : vector<8x128xi1>, vector<8x128xf32>
    %47 = arith.select %38, %40, %46 : vector<8x128xi1>, vector<8x128xf32>
    %48 = vector.shape_cast %47 : vector<8x128xf32> to vector<1x8x128xf32>
    %c0_23 = arith.constant 0 : index
    %c0_24 = arith.constant 0 : index
    %c0_25 = arith.constant 0 : index
    %49 = vector.load %arg8[%c0_23, %c0_24, %c0_25] : memref<1x8x128xf32, #tpu.memory_space<vmem>>, vector<1x8x128xf32>
    tpu.vector_store %arg8[%c0_23, %c0_24, %c0_25], %48 {strides = array<i32>} : memref<1x8x128xf32, #tpu.memory_space<vmem>>, vector<1x8x128xf32>,
    return
  }
  func.func @transform_0(%arg0: i32) -> (i32, i32) {
    %c0_i32 = arith.constant 0 : i32
    %c0_i32_0 = arith.constant 0 : i32
    return %arg0, %c0_i32 : i32, i32
  }
  func.func @transform_1(%arg0: i32) -> (i32, i32) {
    %c0_i32 = arith.constant 0 : i32
    %c0_i32_0 = arith.constant 0 : i32
    return %arg0, %c0_i32 : i32, i32
  }
  func.func @transform_2(%arg0: i32) -> (i32, i32) {
    %c0_i32 = arith.constant 0 : i32
    %c0_i32_0 = arith.constant 0 : i32
    %c0_i32_1 = arith.constant 0 : i32
    return %c0_i32, %c0_i32_0 : i32, i32
  }
  func.func @transform_3(%arg0: i32) -> (i32, i32) {
    %c0_i32 = arith.constant 0 : i32
    %c0_i32_0 = arith.constant 0 : i32
    %c0_i32_1 = arith.constant 0 : i32
    return %c0_i32, %c0_i32_0 : i32, i32
  }
  func.func @transform_4(%arg0: i32) -> (i32, i32) {
    %c0_i32 = arith.constant 0 : i32
    %c0_i32_0 = arith.constant 0 : i32
    return %arg0, %c0_i32 : i32, i32
  }
  func.func @transform_5(%arg0: i32) -> (i32, i32) {
    %c0_i32 = arith.constant 0 : i32
    %c0_i32_0 = arith.constant 0 : i32
    return %arg0, %c0_i32 : i32, i32
  }
  func.func @transform_6(%arg0: i32) -> (i32, i32, i32) {
    %c0_i32 = arith.constant 0 : i32
    %c0_i32_0 = arith.constant 0 : i32
    %c0_i32_1 = arith.constant 0 : i32
    return %arg0, %c0_i32, %c0_i32_0 : i32, i32, i32
  }
  func.func @transform_7(%arg0: i32) -> (i32, i32, i32) {
    %c0_i32 = arith.constant 0 : i32
    %c0_i32_0 = arith.constant 0 : i32
    %c0_i32_1 = arith.constant 0 : i32
    return %arg0, %c0_i32, %c0_i32_0 : i32, i32, i32
  }
}

module attributes {stable_mosaic.version = 11 : i64} {
  func.func @_phase_split_kernel(%arg0: i32, %arg1: memref<32x128xbf16, #tpu.memory_space<vmem>>, %arg2: memref<1x128xf32, #tpu.memory_space<vmem>>, %arg3: memref<1x128xf32, #tpu.memory_space<vmem>>, %arg4: memref<128x128xbf16, #tpu.memory_space<vmem>>, %arg5: memref<32x128xbf16, #tpu.memory_space<vmem>>, %arg6: memref<128x128xbf16, #tpu.memory_space<vmem>>, %arg7: memref<128x128xbf16, #tpu.memory_space<vmem>>, %arg8: memref<32x128xbf16, #tpu.memory_space<vmem>>, %arg9: memref<1x128xf32, #tpu.memory_space<vmem>>, %arg10: memref<1x128xf32, #tpu.memory_space<vmem>>, %arg11: memref<128x128xbf16, #tpu.memory_space<vmem>>, %arg12: memref<32x128xbf16, #tpu.memory_space<vmem>>, %arg13: memref<128x128xbf16, #tpu.memory_space<vmem>>, %arg14: memref<128x128xbf16, #tpu.memory_space<vmem>>, %arg15: memref<32x128xbf16, #tpu.memory_space<vmem>>, %arg16: memref<1x8x128xf32, #tpu.memory_space<vmem>>, %arg17: memref<32x128xbf16, #tpu.memory_space<vmem>>, %arg18: memref<1x8x128xf32, #tpu.memory_space<vmem>>, %arg19: memref<32x128xbf16, #tpu.memory_space<vmem>>, %arg20: memref<1x8x128xf32, #tpu.memory_space<vmem>>, %arg21: memref<32x128xbf16, #tpu.memory_space<vmem>>, %arg22: memref<1x8x128xf32, #tpu.memory_space<vmem>>) attributes {dimension_semantics = [#tpu.dimension_semantics<parallel>], iteration_bounds = array<i64: 1>, scalar_prefetch = 0 : i64, scratch_operands = 0 : i64, tpu.core_type = #tpu.core_type<tc>, window_params = [{transform_indices = @transform_0, window_bounds = array<i64: 32, 128>}, {pipeline_mode = #tpu.pipeline_mode<synchronous>, transform_indices = @transform_1, window_bounds = array<i64: 1, 128>}, {pipeline_mode = #tpu.pipeline_mode<synchronous>, transform_indices = @transform_2, window_bounds = array<i64: 1, 128>}, {pipeline_mode = #tpu.pipeline_mode<synchronous>, transform_indices = @transform_3, window_bounds = array<i64: 128, 128>}, {transform_indices = @transform_4, window_bounds = array<i64: 32, 128>}, {pipeline_mode = #tpu.pipeline_mode<synchronous>, transform_indices = @transform_5, window_bounds = array<i64: 128, 128>}, {pipeline_mode = #tpu.pipeline_mode<synchronous>, transform_indices = @transform_6, window_bounds = array<i64: 128, 128>}, {transform_indices = @transform_7, window_bounds = array<i64: 32, 128>}, {pipeline_mode = #tpu.pipeline_mode<synchronous>, transform_indices = @transform_8, window_bounds = array<i64: 1, 128>}, {pipeline_mode = #tpu.pipeline_mode<synchronous>, transform_indices = @transform_9, window_bounds = array<i64: 1, 128>}, {pipeline_mode = #tpu.pipeline_mode<synchronous>, transform_indices = @transform_10, window_bounds = array<i64: 128, 128>}, {transform_indices = @transform_11, window_bounds = array<i64: 32, 128>}, {pipeline_mode = #tpu.pipeline_mode<synchronous>, transform_indices = @transform_12, window_bounds = array<i64: 128, 128>}, {pipeline_mode = #tpu.pipeline_mode<synchronous>, transform_indices = @transform_13, window_bounds = array<i64: 128, 128>}, {transform_indices = @transform_14, window_bounds = array<i64: 32, 128>}, {transform_indices = @transform_15, window_bounds = array<i64: 1, 8, 128>}, {transform_indices = @transform_16, window_bounds = array<i64: 32, 128>}, {transform_indices = @transform_17, window_bounds = array<i64: 1, 8, 128>}, {transform_indices = @transform_18, window_bounds = array<i64: 32, 128>}, {transform_indices = @transform_19, window_bounds = array<i64: 1, 8, 128>}, {transform_indices = @transform_20, window_bounds = array<i64: 32, 128>}, {transform_indices = @transform_21, window_bounds = array<i64: 1, 8, 128>}]} {
    %c0 = arith.constant 0 : index
    %c0_0 = arith.constant 0 : index
    %0 = vector.load %arg1[%c0, %c0_0] : memref<32x128xbf16, #tpu.memory_space<vmem>>, vector<32x128xbf16>
    %1 = arith.extf %0 : vector<32x128xbf16> to vector<32x128xf32>
    %c0_1 = arith.constant 0 : index
    %c0_2 = arith.constant 0 : index
    %2 = vector.load %arg2[%c0_1, %c0_2] : memref<1x128xf32, #tpu.memory_space<vmem>>, vector<1x128xf32>
    %3 = vector.broadcast %2 : vector<1x128xf32> to vector<32x128xf32>
    %4 = arith.mulf %1, %3 : vector<32x128xf32>
    %c0_3 = arith.constant 0 : index
    %c0_4 = arith.constant 0 : index
    %5 = vector.load %arg3[%c0_3, %c0_4] : memref<1x128xf32, #tpu.memory_space<vmem>>, vector<1x128xf32>
    %6 = vector.broadcast %5 : vector<1x128xf32> to vector<32x128xf32>
    %7 = arith.addf %4, %6 : vector<32x128xf32>
    %cst = arith.constant 0.000000e+00 : f32
    %8 = vector.broadcast %cst : f32 to vector<32x128xf32>
    %9 = arith.maximumf %7, %8 : vector<32x128xf32>
    %10 = arith.truncf %9 : vector<32x128xf32> to vector<32x128xbf16>
    %c0_5 = arith.constant 0 : index
    %c0_6 = arith.constant 0 : index
    %11 = vector.load %arg4[%c0_5, %c0_6] : memref<128x128xbf16, #tpu.memory_space<vmem>>, vector<128x128xbf16>
    %cst_7 = arith.constant dense<0.000000e+00> : vector<32x128xf32>
    %12 = tpu.matmul %10, %11, %cst_7 {dimension_numbers = #tpu.dot_dimension_numbers<[1], [0], [0], [1], [0, 0, 1, 1], [], []>} : vector<32x128xbf16>, vector<128x128xbf16>, vector<32x128xf32> -> vector<32x128xf32>
    %13 = arith.truncf %12 : vector<32x128xf32> to vector<32x128xbf16>
    %c0_8 = arith.constant 0 : index
    %c0_9 = arith.constant 0 : index
    %14 = vector.load %arg15[%c0_8, %c0_9] : memref<32x128xbf16, #tpu.memory_space<vmem>>, vector<32x128xbf16>
    tpu.vector_store %arg15[%c0_8, %c0_9], %13 {strides = array<i32>} : memref<32x128xbf16, #tpu.memory_space<vmem>>, vector<32x128xbf16>,
    %15 = arith.extf %13 : vector<32x128xbf16> to vector<32x128xf32>
    %cst_10 = arith.constant dense<0.000000e+00> : vector<128xf32>
    %16 = vector.multi_reduction <add>, %15, %cst_10 [0] : vector<32x128xf32> to vector<128xf32>
    %17 = vector.shape_cast %16 : vector<128xf32> to vector<1x128xf32>
    %18 = arith.mulf %15, %15 : vector<32x128xf32>
    %cst_11 = arith.constant dense<0.000000e+00> : vector<128xf32>
    %19 = vector.multi_reduction <add>, %18, %cst_11 [0] : vector<32x128xf32> to vector<128xf32>
    %20 = vector.shape_cast %19 : vector<128xf32> to vector<1x128xf32>
    %21 = tpu.iota {dimensions = array<i32: 0>} : vector<8x128xi32>
    %c0_i32 = arith.constant 0 : i32
    %22 = vector.broadcast %c0_i32 : i32 to vector<8x128xi32>
    %23 = arith.cmpi eq, %21, %22 : vector<8x128xi32>
    %24 = vector.shape_cast %17 : vector<1x128xf32> to vector<1x128xf32>
    %25 = vector.broadcast %24 : vector<1x128xf32> to vector<8x128xf32>
    %c1_i32 = arith.constant 1 : i32
    %26 = vector.broadcast %c1_i32 : i32 to vector<8x128xi32>
    %27 = arith.cmpi eq, %21, %26 : vector<8x128xi32>
    %28 = vector.shape_cast %20 : vector<1x128xf32> to vector<1x128xf32>
    %29 = vector.broadcast %28 : vector<1x128xf32> to vector<8x128xf32>
    %cst_12 = arith.constant 0.000000e+00 : f32
    %30 = vector.broadcast %cst_12 : f32 to vector<8x128xf32>
    %31 = arith.select %27, %29, %30 : vector<8x128xi1>, vector<8x128xf32>
    %32 = arith.select %23, %25, %31 : vector<8x128xi1>, vector<8x128xf32>
    %33 = vector.shape_cast %32 : vector<8x128xf32> to vector<1x8x128xf32>
    %c0_13 = arith.constant 0 : index
    %c0_14 = arith.constant 0 : index
    %c0_15 = arith.constant 0 : index
    %34 = vector.load %arg16[%c0_13, %c0_14, %c0_15] : memref<1x8x128xf32, #tpu.memory_space<vmem>>, vector<1x8x128xf32>
    tpu.vector_store %arg16[%c0_13, %c0_14, %c0_15], %33 {strides = array<i32>} : memref<1x8x128xf32, #tpu.memory_space<vmem>>, vector<1x8x128xf32>,
    %c0_16 = arith.constant 0 : index
    %c0_17 = arith.constant 0 : index
    %35 = vector.load %arg5[%c0_16, %c0_17] : memref<32x128xbf16, #tpu.memory_space<vmem>>, vector<32x128xbf16>
    %c0_18 = arith.constant 0 : index
    %c0_19 = arith.constant 0 : index
    %36 = vector.load %arg6[%c0_18, %c0_19] : memref<128x128xbf16, #tpu.memory_space<vmem>>, vector<128x128xbf16>
    %cst_20 = arith.constant dense<0.000000e+00> : vector<32x128xf32>
    %37 = tpu.matmul %35, %36, %cst_20 {dimension_numbers = #tpu.dot_dimension_numbers<[1], [0], [0], [1], [0, 0, 1, 1], [], []>} : vector<32x128xbf16>, vector<128x128xbf16>, vector<32x128xf32> -> vector<32x128xf32>
    %c0_21 = arith.constant 0 : index
    %c0_22 = arith.constant 0 : index
    %38 = vector.load %arg7[%c0_21, %c0_22] : memref<128x128xbf16, #tpu.memory_space<vmem>>, vector<128x128xbf16>
    %cst_23 = arith.constant dense<0.000000e+00> : vector<32x128xf32>
    %39 = tpu.matmul %10, %38, %cst_23 {dimension_numbers = #tpu.dot_dimension_numbers<[1], [0], [0], [1], [0, 0, 1, 1], [], []>} : vector<32x128xbf16>, vector<128x128xbf16>, vector<32x128xf32> -> vector<32x128xf32>
    %40 = arith.addf %37, %39 : vector<32x128xf32>
    %41 = arith.truncf %40 : vector<32x128xf32> to vector<32x128xbf16>
    %c0_24 = arith.constant 0 : index
    %c0_25 = arith.constant 0 : index
    %42 = vector.load %arg17[%c0_24, %c0_25] : memref<32x128xbf16, #tpu.memory_space<vmem>>, vector<32x128xbf16>
    tpu.vector_store %arg17[%c0_24, %c0_25], %41 {strides = array<i32>} : memref<32x128xbf16, #tpu.memory_space<vmem>>, vector<32x128xbf16>,
    %43 = arith.extf %41 : vector<32x128xbf16> to vector<32x128xf32>
    %cst_26 = arith.constant dense<0.000000e+00> : vector<128xf32>
    %44 = vector.multi_reduction <add>, %43, %cst_26 [0] : vector<32x128xf32> to vector<128xf32>
    %45 = vector.shape_cast %44 : vector<128xf32> to vector<1x128xf32>
    %46 = arith.mulf %43, %43 : vector<32x128xf32>
    %cst_27 = arith.constant dense<0.000000e+00> : vector<128xf32>
    %47 = vector.multi_reduction <add>, %46, %cst_27 [0] : vector<32x128xf32> to vector<128xf32>
    %48 = vector.shape_cast %47 : vector<128xf32> to vector<1x128xf32>
    %49 = tpu.iota {dimensions = array<i32: 0>} : vector<8x128xi32>
    %c0_i32_28 = arith.constant 0 : i32
    %50 = vector.broadcast %c0_i32_28 : i32 to vector<8x128xi32>
    %51 = arith.cmpi eq, %49, %50 : vector<8x128xi32>
    %52 = vector.shape_cast %45 : vector<1x128xf32> to vector<1x128xf32>
    %53 = vector.broadcast %52 : vector<1x128xf32> to vector<8x128xf32>
    %c1_i32_29 = arith.constant 1 : i32
    %54 = vector.broadcast %c1_i32_29 : i32 to vector<8x128xi32>
    %55 = arith.cmpi eq, %49, %54 : vector<8x128xi32>
    %56 = vector.shape_cast %48 : vector<1x128xf32> to vector<1x128xf32>
    %57 = vector.broadcast %56 : vector<1x128xf32> to vector<8x128xf32>
    %cst_30 = arith.constant 0.000000e+00 : f32
    %58 = vector.broadcast %cst_30 : f32 to vector<8x128xf32>
    %59 = arith.select %55, %57, %58 : vector<8x128xi1>, vector<8x128xf32>
    %60 = arith.select %51, %53, %59 : vector<8x128xi1>, vector<8x128xf32>
    %61 = vector.shape_cast %60 : vector<8x128xf32> to vector<1x8x128xf32>
    %c0_31 = arith.constant 0 : index
    %c0_32 = arith.constant 0 : index
    %c0_33 = arith.constant 0 : index
    %62 = vector.load %arg18[%c0_31, %c0_32, %c0_33] : memref<1x8x128xf32, #tpu.memory_space<vmem>>, vector<1x8x128xf32>
    tpu.vector_store %arg18[%c0_31, %c0_32, %c0_33], %61 {strides = array<i32>} : memref<1x8x128xf32, #tpu.memory_space<vmem>>, vector<1x8x128xf32>,
    %c0_34 = arith.constant 0 : index
    %c0_35 = arith.constant 0 : index
    %63 = vector.load %arg8[%c0_34, %c0_35] : memref<32x128xbf16, #tpu.memory_space<vmem>>, vector<32x128xbf16>
    %64 = arith.extf %63 : vector<32x128xbf16> to vector<32x128xf32>
    %c0_36 = arith.constant 0 : index
    %c0_37 = arith.constant 0 : index
    %65 = vector.load %arg9[%c0_36, %c0_37] : memref<1x128xf32, #tpu.memory_space<vmem>>, vector<1x128xf32>
    %66 = vector.broadcast %65 : vector<1x128xf32> to vector<32x128xf32>
    %67 = arith.mulf %64, %66 : vector<32x128xf32>
    %c0_38 = arith.constant 0 : index
    %c0_39 = arith.constant 0 : index
    %68 = vector.load %arg10[%c0_38, %c0_39] : memref<1x128xf32, #tpu.memory_space<vmem>>, vector<1x128xf32>
    %69 = vector.broadcast %68 : vector<1x128xf32> to vector<32x128xf32>
    %70 = arith.addf %67, %69 : vector<32x128xf32>
    %cst_40 = arith.constant 0.000000e+00 : f32
    %71 = vector.broadcast %cst_40 : f32 to vector<32x128xf32>
    %72 = arith.maximumf %70, %71 : vector<32x128xf32>
    %73 = arith.truncf %72 : vector<32x128xf32> to vector<32x128xbf16>
    %c0_41 = arith.constant 0 : index
    %c0_42 = arith.constant 0 : index
    %74 = vector.load %arg11[%c0_41, %c0_42] : memref<128x128xbf16, #tpu.memory_space<vmem>>, vector<128x128xbf16>
    %cst_43 = arith.constant dense<0.000000e+00> : vector<32x128xf32>
    %75 = tpu.matmul %73, %74, %cst_43 {dimension_numbers = #tpu.dot_dimension_numbers<[1], [0], [0], [1], [0, 0, 1, 1], [], []>} : vector<32x128xbf16>, vector<128x128xbf16>, vector<32x128xf32> -> vector<32x128xf32>
    %76 = arith.truncf %75 : vector<32x128xf32> to vector<32x128xbf16>
    %c0_44 = arith.constant 0 : index
    %c0_45 = arith.constant 0 : index
    %77 = vector.load %arg19[%c0_44, %c0_45] : memref<32x128xbf16, #tpu.memory_space<vmem>>, vector<32x128xbf16>
    tpu.vector_store %arg19[%c0_44, %c0_45], %76 {strides = array<i32>} : memref<32x128xbf16, #tpu.memory_space<vmem>>, vector<32x128xbf16>,
    %78 = arith.extf %76 : vector<32x128xbf16> to vector<32x128xf32>
    %cst_46 = arith.constant dense<0.000000e+00> : vector<128xf32>
    %79 = vector.multi_reduction <add>, %78, %cst_46 [0] : vector<32x128xf32> to vector<128xf32>
    %80 = vector.shape_cast %79 : vector<128xf32> to vector<1x128xf32>
    %81 = arith.mulf %78, %78 : vector<32x128xf32>
    %cst_47 = arith.constant dense<0.000000e+00> : vector<128xf32>
    %82 = vector.multi_reduction <add>, %81, %cst_47 [0] : vector<32x128xf32> to vector<128xf32>
    %83 = vector.shape_cast %82 : vector<128xf32> to vector<1x128xf32>
    %84 = tpu.iota {dimensions = array<i32: 0>} : vector<8x128xi32>
    %c0_i32_48 = arith.constant 0 : i32
    %85 = vector.broadcast %c0_i32_48 : i32 to vector<8x128xi32>
    %86 = arith.cmpi eq, %84, %85 : vector<8x128xi32>
    %87 = vector.shape_cast %80 : vector<1x128xf32> to vector<1x128xf32>
    %88 = vector.broadcast %87 : vector<1x128xf32> to vector<8x128xf32>
    %c1_i32_49 = arith.constant 1 : i32
    %89 = vector.broadcast %c1_i32_49 : i32 to vector<8x128xi32>
    %90 = arith.cmpi eq, %84, %89 : vector<8x128xi32>
    %91 = vector.shape_cast %83 : vector<1x128xf32> to vector<1x128xf32>
    %92 = vector.broadcast %91 : vector<1x128xf32> to vector<8x128xf32>
    %cst_50 = arith.constant 0.000000e+00 : f32
    %93 = vector.broadcast %cst_50 : f32 to vector<8x128xf32>
    %94 = arith.select %90, %92, %93 : vector<8x128xi1>, vector<8x128xf32>
    %95 = arith.select %86, %88, %94 : vector<8x128xi1>, vector<8x128xf32>
    %96 = vector.shape_cast %95 : vector<8x128xf32> to vector<1x8x128xf32>
    %c0_51 = arith.constant 0 : index
    %c0_52 = arith.constant 0 : index
    %c0_53 = arith.constant 0 : index
    %97 = vector.load %arg20[%c0_51, %c0_52, %c0_53] : memref<1x8x128xf32, #tpu.memory_space<vmem>>, vector<1x8x128xf32>
    tpu.vector_store %arg20[%c0_51, %c0_52, %c0_53], %96 {strides = array<i32>} : memref<1x8x128xf32, #tpu.memory_space<vmem>>, vector<1x8x128xf32>,
    %c0_54 = arith.constant 0 : index
    %c0_55 = arith.constant 0 : index
    %98 = vector.load %arg12[%c0_54, %c0_55] : memref<32x128xbf16, #tpu.memory_space<vmem>>, vector<32x128xbf16>
    %c0_56 = arith.constant 0 : index
    %c0_57 = arith.constant 0 : index
    %99 = vector.load %arg13[%c0_56, %c0_57] : memref<128x128xbf16, #tpu.memory_space<vmem>>, vector<128x128xbf16>
    %cst_58 = arith.constant dense<0.000000e+00> : vector<32x128xf32>
    %100 = tpu.matmul %98, %99, %cst_58 {dimension_numbers = #tpu.dot_dimension_numbers<[1], [0], [0], [1], [0, 0, 1, 1], [], []>} : vector<32x128xbf16>, vector<128x128xbf16>, vector<32x128xf32> -> vector<32x128xf32>
    %c0_59 = arith.constant 0 : index
    %c0_60 = arith.constant 0 : index
    %101 = vector.load %arg14[%c0_59, %c0_60] : memref<128x128xbf16, #tpu.memory_space<vmem>>, vector<128x128xbf16>
    %cst_61 = arith.constant dense<0.000000e+00> : vector<32x128xf32>
    %102 = tpu.matmul %73, %101, %cst_61 {dimension_numbers = #tpu.dot_dimension_numbers<[1], [0], [0], [1], [0, 0, 1, 1], [], []>} : vector<32x128xbf16>, vector<128x128xbf16>, vector<32x128xf32> -> vector<32x128xf32>
    %103 = arith.addf %100, %102 : vector<32x128xf32>
    %104 = arith.truncf %103 : vector<32x128xf32> to vector<32x128xbf16>
    %c0_62 = arith.constant 0 : index
    %c0_63 = arith.constant 0 : index
    %105 = vector.load %arg21[%c0_62, %c0_63] : memref<32x128xbf16, #tpu.memory_space<vmem>>, vector<32x128xbf16>
    tpu.vector_store %arg21[%c0_62, %c0_63], %104 {strides = array<i32>} : memref<32x128xbf16, #tpu.memory_space<vmem>>, vector<32x128xbf16>,
    %106 = arith.extf %104 : vector<32x128xbf16> to vector<32x128xf32>
    %cst_64 = arith.constant dense<0.000000e+00> : vector<128xf32>
    %107 = vector.multi_reduction <add>, %106, %cst_64 [0] : vector<32x128xf32> to vector<128xf32>
    %108 = vector.shape_cast %107 : vector<128xf32> to vector<1x128xf32>
    %109 = arith.mulf %106, %106 : vector<32x128xf32>
    %cst_65 = arith.constant dense<0.000000e+00> : vector<128xf32>
    %110 = vector.multi_reduction <add>, %109, %cst_65 [0] : vector<32x128xf32> to vector<128xf32>
    %111 = vector.shape_cast %110 : vector<128xf32> to vector<1x128xf32>
    %112 = tpu.iota {dimensions = array<i32: 0>} : vector<8x128xi32>
    %c0_i32_66 = arith.constant 0 : i32
    %113 = vector.broadcast %c0_i32_66 : i32 to vector<8x128xi32>
    %114 = arith.cmpi eq, %112, %113 : vector<8x128xi32>
    %115 = vector.shape_cast %108 : vector<1x128xf32> to vector<1x128xf32>
    %116 = vector.broadcast %115 : vector<1x128xf32> to vector<8x128xf32>
    %c1_i32_67 = arith.constant 1 : i32
    %117 = vector.broadcast %c1_i32_67 : i32 to vector<8x128xi32>
    %118 = arith.cmpi eq, %112, %117 : vector<8x128xi32>
    %119 = vector.shape_cast %111 : vector<1x128xf32> to vector<1x128xf32>
    %120 = vector.broadcast %119 : vector<1x128xf32> to vector<8x128xf32>
    %cst_68 = arith.constant 0.000000e+00 : f32
    %121 = vector.broadcast %cst_68 : f32 to vector<8x128xf32>
    %122 = arith.select %118, %120, %121 : vector<8x128xi1>, vector<8x128xf32>
    %123 = arith.select %114, %116, %122 : vector<8x128xi1>, vector<8x128xf32>
    %124 = vector.shape_cast %123 : vector<8x128xf32> to vector<1x8x128xf32>
    %c0_69 = arith.constant 0 : index
    %c0_70 = arith.constant 0 : index
    %c0_71 = arith.constant 0 : index
    %125 = vector.load %arg22[%c0_69, %c0_70, %c0_71] : memref<1x8x128xf32, #tpu.memory_space<vmem>>, vector<1x8x128xf32>
    tpu.vector_store %arg22[%c0_69, %c0_70, %c0_71], %124 {strides = array<i32>} : memref<1x8x128xf32, #tpu.memory_space<vmem>>, vector<1x8x128xf32>,
    return
  }
  func.func @transform_0(%arg0: i32) -> (i32, i32) {
    %c0_i32 = arith.constant 0 : i32
    %c0_i32_0 = arith.constant 0 : i32
    return %arg0, %c0_i32 : i32, i32
  }
  func.func @transform_1(%arg0: i32) -> (i32, i32) {
    %c0_i32 = arith.constant 0 : i32
    %c0_i32_0 = arith.constant 0 : i32
    %c0_i32_1 = arith.constant 0 : i32
    return %c0_i32, %c0_i32_0 : i32, i32
  }
  func.func @transform_2(%arg0: i32) -> (i32, i32) {
    %c0_i32 = arith.constant 0 : i32
    %c0_i32_0 = arith.constant 0 : i32
    %c0_i32_1 = arith.constant 0 : i32
    return %c0_i32, %c0_i32_0 : i32, i32
  }
  func.func @transform_3(%arg0: i32) -> (i32, i32) {
    %c0_i32 = arith.constant 0 : i32
    %c0_i32_0 = arith.constant 0 : i32
    %c0_i32_1 = arith.constant 0 : i32
    return %c0_i32, %c0_i32_0 : i32, i32
  }
  func.func @transform_4(%arg0: i32) -> (i32, i32) {
    %c0_i32 = arith.constant 0 : i32
    %c0_i32_0 = arith.constant 0 : i32
    return %arg0, %c0_i32 : i32, i32
  }
  func.func @transform_5(%arg0: i32) -> (i32, i32) {
    %c0_i32 = arith.constant 0 : i32
    %c0_i32_0 = arith.constant 0 : i32
    %c0_i32_1 = arith.constant 0 : i32
    return %c0_i32, %c0_i32_0 : i32, i32
  }
  func.func @transform_6(%arg0: i32) -> (i32, i32) {
    %c0_i32 = arith.constant 0 : i32
    %c0_i32_0 = arith.constant 0 : i32
    %c0_i32_1 = arith.constant 0 : i32
    return %c0_i32, %c0_i32_0 : i32, i32
  }
  func.func @transform_7(%arg0: i32) -> (i32, i32) {
    %c0_i32 = arith.constant 0 : i32
    %c0_i32_0 = arith.constant 0 : i32
    return %arg0, %c0_i32 : i32, i32
  }
  func.func @transform_8(%arg0: i32) -> (i32, i32) {
    %c0_i32 = arith.constant 0 : i32
    %c0_i32_0 = arith.constant 0 : i32
    %c0_i32_1 = arith.constant 0 : i32
    return %c0_i32, %c0_i32_0 : i32, i32
  }
  func.func @transform_9(%arg0: i32) -> (i32, i32) {
    %c0_i32 = arith.constant 0 : i32
    %c0_i32_0 = arith.constant 0 : i32
    %c0_i32_1 = arith.constant 0 : i32
    return %c0_i32, %c0_i32_0 : i32, i32
  }
  func.func @transform_10(%arg0: i32) -> (i32, i32) {
    %c0_i32 = arith.constant 0 : i32
    %c0_i32_0 = arith.constant 0 : i32
    %c0_i32_1 = arith.constant 0 : i32
    return %c0_i32, %c0_i32_0 : i32, i32
  }
  func.func @transform_11(%arg0: i32) -> (i32, i32) {
    %c0_i32 = arith.constant 0 : i32
    %c0_i32_0 = arith.constant 0 : i32
    return %arg0, %c0_i32 : i32, i32
  }
  func.func @transform_12(%arg0: i32) -> (i32, i32) {
    %c0_i32 = arith.constant 0 : i32
    %c0_i32_0 = arith.constant 0 : i32
    %c0_i32_1 = arith.constant 0 : i32
    return %c0_i32, %c0_i32_0 : i32, i32
  }
  func.func @transform_13(%arg0: i32) -> (i32, i32) {
    %c0_i32 = arith.constant 0 : i32
    %c0_i32_0 = arith.constant 0 : i32
    %c0_i32_1 = arith.constant 0 : i32
    return %c0_i32, %c0_i32_0 : i32, i32
  }
  func.func @transform_14(%arg0: i32) -> (i32, i32) {
    %c0_i32 = arith.constant 0 : i32
    %c0_i32_0 = arith.constant 0 : i32
    return %arg0, %c0_i32 : i32, i32
  }
  func.func @transform_15(%arg0: i32) -> (i32, i32, i32) {
    %c0_i32 = arith.constant 0 : i32
    %c0_i32_0 = arith.constant 0 : i32
    %c0_i32_1 = arith.constant 0 : i32
    return %arg0, %c0_i32, %c0_i32_0 : i32, i32, i32
  }
  func.func @transform_16(%arg0: i32) -> (i32, i32) {
    %c0_i32 = arith.constant 0 : i32
    %c0_i32_0 = arith.constant 0 : i32
    return %arg0, %c0_i32 : i32, i32
  }
  func.func @transform_17(%arg0: i32) -> (i32, i32, i32) {
    %c0_i32 = arith.constant 0 : i32
    %c0_i32_0 = arith.constant 0 : i32
    %c0_i32_1 = arith.constant 0 : i32
    return %arg0, %c0_i32, %c0_i32_0 : i32, i32, i32
  }
  func.func @transform_18(%arg0: i32) -> (i32, i32) {
    %c0_i32 = arith.constant 0 : i32
    %c0_i32_0 = arith.constant 0 : i32
    return %arg0, %c0_i32 : i32, i32
  }
  func.func @transform_19(%arg0: i32) -> (i32, i32, i32) {
    %c0_i32 = arith.constant 0 : i32
    %c0_i32_0 = arith.constant 0 : i32
    %c0_i32_1 = arith.constant 0 : i32
    return %arg0, %c0_i32, %c0_i32_0 : i32, i32, i32
  }
  func.func @transform_20(%arg0: i32) -> (i32, i32) {
    %c0_i32 = arith.constant 0 : i32
    %c0_i32_0 = arith.constant 0 : i32
    return %arg0, %c0_i32 : i32, i32
  }
  func.func @transform_21(%arg0: i32) -> (i32, i32, i32) {
    %c0_i32 = arith.constant 0 : i32
    %c0_i32_0 = arith.constant 0 : i32
    %c0_i32_1 = arith.constant 0 : i32
    return %arg0, %c0_i32, %c0_i32_0 : i32, i32, i32
  }
}

module attributes {stable_mosaic.version = 11 : i64} {
  func.func @_phase_out_kernel(%arg0: i32, %arg1: memref<32x128xbf16, #tpu.memory_space<vmem>>, %arg2: memref<1x128xf32, #tpu.memory_space<vmem>>, %arg3: memref<1x128xf32, #tpu.memory_space<vmem>>, %arg4: memref<128x128xbf16, #tpu.memory_space<vmem>>, %arg5: memref<32x128xbf16, #tpu.memory_space<vmem>>, %arg6: memref<1x128xf32, #tpu.memory_space<vmem>>, %arg7: memref<1x128xf32, #tpu.memory_space<vmem>>, %arg8: memref<128x128xbf16, #tpu.memory_space<vmem>>, %arg9: memref<32x128xbf16, #tpu.memory_space<vmem>>, %arg10: memref<1x128xf32, #tpu.memory_space<vmem>>, %arg11: memref<1x128xf32, #tpu.memory_space<vmem>>, %arg12: memref<128x128xbf16, #tpu.memory_space<vmem>>, %arg13: memref<32x128xbf16, #tpu.memory_space<vmem>>, %arg14: memref<1x128xf32, #tpu.memory_space<vmem>>, %arg15: memref<1x128xf32, #tpu.memory_space<vmem>>, %arg16: memref<128x128xbf16, #tpu.memory_space<vmem>>, %arg17: memref<1x128xf32, #tpu.memory_space<vmem>>, %arg18: memref<32x128xf32, #tpu.memory_space<vmem>>) attributes {dimension_semantics = [#tpu.dimension_semantics<parallel>], iteration_bounds = array<i64: 1>, scalar_prefetch = 0 : i64, scratch_operands = 0 : i64, tpu.core_type = #tpu.core_type<tc>, window_params = [{transform_indices = @transform_0, window_bounds = array<i64: 32, 128>}, {pipeline_mode = #tpu.pipeline_mode<synchronous>, transform_indices = @transform_1, window_bounds = array<i64: 1, 128>}, {pipeline_mode = #tpu.pipeline_mode<synchronous>, transform_indices = @transform_2, window_bounds = array<i64: 1, 128>}, {pipeline_mode = #tpu.pipeline_mode<synchronous>, transform_indices = @transform_3, window_bounds = array<i64: 128, 128>}, {transform_indices = @transform_4, window_bounds = array<i64: 32, 128>}, {pipeline_mode = #tpu.pipeline_mode<synchronous>, transform_indices = @transform_5, window_bounds = array<i64: 1, 128>}, {pipeline_mode = #tpu.pipeline_mode<synchronous>, transform_indices = @transform_6, window_bounds = array<i64: 1, 128>}, {pipeline_mode = #tpu.pipeline_mode<synchronous>, transform_indices = @transform_7, window_bounds = array<i64: 128, 128>}, {transform_indices = @transform_8, window_bounds = array<i64: 32, 128>}, {pipeline_mode = #tpu.pipeline_mode<synchronous>, transform_indices = @transform_9, window_bounds = array<i64: 1, 128>}, {pipeline_mode = #tpu.pipeline_mode<synchronous>, transform_indices = @transform_10, window_bounds = array<i64: 1, 128>}, {pipeline_mode = #tpu.pipeline_mode<synchronous>, transform_indices = @transform_11, window_bounds = array<i64: 128, 128>}, {transform_indices = @transform_12, window_bounds = array<i64: 32, 128>}, {pipeline_mode = #tpu.pipeline_mode<synchronous>, transform_indices = @transform_13, window_bounds = array<i64: 1, 128>}, {pipeline_mode = #tpu.pipeline_mode<synchronous>, transform_indices = @transform_14, window_bounds = array<i64: 1, 128>}, {pipeline_mode = #tpu.pipeline_mode<synchronous>, transform_indices = @transform_15, window_bounds = array<i64: 128, 128>}, {pipeline_mode = #tpu.pipeline_mode<synchronous>, transform_indices = @transform_16, window_bounds = array<i64: 1, 128>}, {transform_indices = @transform_17, window_bounds = array<i64: 32, 128>}]} {
    %c0 = arith.constant 0 : index
    %c0_0 = arith.constant 0 : index
    %0 = vector.load %arg1[%c0, %c0_0] : memref<32x128xbf16, #tpu.memory_space<vmem>>, vector<32x128xbf16>
    %1 = arith.extf %0 : vector<32x128xbf16> to vector<32x128xf32>
    %c0_1 = arith.constant 0 : index
    %c0_2 = arith.constant 0 : index
    %2 = vector.load %arg2[%c0_1, %c0_2] : memref<1x128xf32, #tpu.memory_space<vmem>>, vector<1x128xf32>
    %3 = vector.broadcast %2 : vector<1x128xf32> to vector<32x128xf32>
    %4 = arith.mulf %1, %3 : vector<32x128xf32>
    %c0_3 = arith.constant 0 : index
    %c0_4 = arith.constant 0 : index
    %5 = vector.load %arg3[%c0_3, %c0_4] : memref<1x128xf32, #tpu.memory_space<vmem>>, vector<1x128xf32>
    %6 = vector.broadcast %5 : vector<1x128xf32> to vector<32x128xf32>
    %7 = arith.addf %4, %6 : vector<32x128xf32>
    %cst = arith.constant 0.000000e+00 : f32
    %8 = vector.broadcast %cst : f32 to vector<32x128xf32>
    %9 = arith.maximumf %7, %8 : vector<32x128xf32>
    %10 = arith.truncf %9 : vector<32x128xf32> to vector<32x128xbf16>
    %c0_5 = arith.constant 0 : index
    %c0_6 = arith.constant 0 : index
    %11 = vector.load %arg4[%c0_5, %c0_6] : memref<128x128xbf16, #tpu.memory_space<vmem>>, vector<128x128xbf16>
    %cst_7 = arith.constant dense<0.000000e+00> : vector<32x128xf32>
    %12 = tpu.matmul %10, %11, %cst_7 {dimension_numbers = #tpu.dot_dimension_numbers<[1], [0], [0], [1], [0, 0, 1, 1], [], []>} : vector<32x128xbf16>, vector<128x128xbf16>, vector<32x128xf32> -> vector<32x128xf32>
    %c0_8 = arith.constant 0 : index
    %c0_9 = arith.constant 0 : index
    %13 = vector.load %arg5[%c0_8, %c0_9] : memref<32x128xbf16, #tpu.memory_space<vmem>>, vector<32x128xbf16>
    %14 = arith.extf %13 : vector<32x128xbf16> to vector<32x128xf32>
    %c0_10 = arith.constant 0 : index
    %c0_11 = arith.constant 0 : index
    %15 = vector.load %arg6[%c0_10, %c0_11] : memref<1x128xf32, #tpu.memory_space<vmem>>, vector<1x128xf32>
    %16 = vector.broadcast %15 : vector<1x128xf32> to vector<32x128xf32>
    %17 = arith.mulf %14, %16 : vector<32x128xf32>
    %c0_12 = arith.constant 0 : index
    %c0_13 = arith.constant 0 : index
    %18 = vector.load %arg7[%c0_12, %c0_13] : memref<1x128xf32, #tpu.memory_space<vmem>>, vector<1x128xf32>
    %19 = vector.broadcast %18 : vector<1x128xf32> to vector<32x128xf32>
    %20 = arith.addf %17, %19 : vector<32x128xf32>
    %cst_14 = arith.constant 0.000000e+00 : f32
    %21 = vector.broadcast %cst_14 : f32 to vector<32x128xf32>
    %22 = arith.maximumf %20, %21 : vector<32x128xf32>
    %23 = arith.truncf %22 : vector<32x128xf32> to vector<32x128xbf16>
    %c0_15 = arith.constant 0 : index
    %c0_16 = arith.constant 0 : index
    %24 = vector.load %arg8[%c0_15, %c0_16] : memref<128x128xbf16, #tpu.memory_space<vmem>>, vector<128x128xbf16>
    %cst_17 = arith.constant dense<0.000000e+00> : vector<32x128xf32>
    %25 = tpu.matmul %23, %24, %cst_17 {dimension_numbers = #tpu.dot_dimension_numbers<[1], [0], [0], [1], [0, 0, 1, 1], [], []>} : vector<32x128xbf16>, vector<128x128xbf16>, vector<32x128xf32> -> vector<32x128xf32>
    %26 = arith.addf %12, %25 : vector<32x128xf32>
    %c0_18 = arith.constant 0 : index
    %c0_19 = arith.constant 0 : index
    %27 = vector.load %arg9[%c0_18, %c0_19] : memref<32x128xbf16, #tpu.memory_space<vmem>>, vector<32x128xbf16>
    %28 = arith.extf %27 : vector<32x128xbf16> to vector<32x128xf32>
    %c0_20 = arith.constant 0 : index
    %c0_21 = arith.constant 0 : index
    %29 = vector.load %arg10[%c0_20, %c0_21] : memref<1x128xf32, #tpu.memory_space<vmem>>, vector<1x128xf32>
    %30 = vector.broadcast %29 : vector<1x128xf32> to vector<32x128xf32>
    %31 = arith.mulf %28, %30 : vector<32x128xf32>
    %c0_22 = arith.constant 0 : index
    %c0_23 = arith.constant 0 : index
    %32 = vector.load %arg11[%c0_22, %c0_23] : memref<1x128xf32, #tpu.memory_space<vmem>>, vector<1x128xf32>
    %33 = vector.broadcast %32 : vector<1x128xf32> to vector<32x128xf32>
    %34 = arith.addf %31, %33 : vector<32x128xf32>
    %cst_24 = arith.constant 0.000000e+00 : f32
    %35 = vector.broadcast %cst_24 : f32 to vector<32x128xf32>
    %36 = arith.maximumf %34, %35 : vector<32x128xf32>
    %37 = arith.truncf %36 : vector<32x128xf32> to vector<32x128xbf16>
    %c0_25 = arith.constant 0 : index
    %c0_26 = arith.constant 0 : index
    %38 = vector.load %arg12[%c0_25, %c0_26] : memref<128x128xbf16, #tpu.memory_space<vmem>>, vector<128x128xbf16>
    %cst_27 = arith.constant dense<0.000000e+00> : vector<32x128xf32>
    %39 = tpu.matmul %37, %38, %cst_27 {dimension_numbers = #tpu.dot_dimension_numbers<[1], [0], [0], [1], [0, 0, 1, 1], [], []>} : vector<32x128xbf16>, vector<128x128xbf16>, vector<32x128xf32> -> vector<32x128xf32>
    %40 = arith.addf %26, %39 : vector<32x128xf32>
    %c0_28 = arith.constant 0 : index
    %c0_29 = arith.constant 0 : index
    %41 = vector.load %arg13[%c0_28, %c0_29] : memref<32x128xbf16, #tpu.memory_space<vmem>>, vector<32x128xbf16>
    %42 = arith.extf %41 : vector<32x128xbf16> to vector<32x128xf32>
    %c0_30 = arith.constant 0 : index
    %c0_31 = arith.constant 0 : index
    %43 = vector.load %arg14[%c0_30, %c0_31] : memref<1x128xf32, #tpu.memory_space<vmem>>, vector<1x128xf32>
    %44 = vector.broadcast %43 : vector<1x128xf32> to vector<32x128xf32>
    %45 = arith.mulf %42, %44 : vector<32x128xf32>
    %c0_32 = arith.constant 0 : index
    %c0_33 = arith.constant 0 : index
    %46 = vector.load %arg15[%c0_32, %c0_33] : memref<1x128xf32, #tpu.memory_space<vmem>>, vector<1x128xf32>
    %47 = vector.broadcast %46 : vector<1x128xf32> to vector<32x128xf32>
    %48 = arith.addf %45, %47 : vector<32x128xf32>
    %cst_34 = arith.constant 0.000000e+00 : f32
    %49 = vector.broadcast %cst_34 : f32 to vector<32x128xf32>
    %50 = arith.maximumf %48, %49 : vector<32x128xf32>
    %51 = arith.truncf %50 : vector<32x128xf32> to vector<32x128xbf16>
    %c0_35 = arith.constant 0 : index
    %c0_36 = arith.constant 0 : index
    %52 = vector.load %arg16[%c0_35, %c0_36] : memref<128x128xbf16, #tpu.memory_space<vmem>>, vector<128x128xbf16>
    %cst_37 = arith.constant dense<0.000000e+00> : vector<32x128xf32>
    %53 = tpu.matmul %51, %52, %cst_37 {dimension_numbers = #tpu.dot_dimension_numbers<[1], [0], [0], [1], [0, 0, 1, 1], [], []>} : vector<32x128xbf16>, vector<128x128xbf16>, vector<32x128xf32> -> vector<32x128xf32>
    %54 = arith.addf %40, %53 : vector<32x128xf32>
    %cst_38 = arith.constant 5.000000e-01 : f32
    %55 = vector.broadcast %cst_38 : f32 to vector<32x128xf32>
    %56 = arith.mulf %55, %54 : vector<32x128xf32>
    %c0_39 = arith.constant 0 : index
    %c0_40 = arith.constant 0 : index
    %57 = vector.load %arg17[%c0_39, %c0_40] : memref<1x128xf32, #tpu.memory_space<vmem>>, vector<1x128xf32>
    %58 = vector.broadcast %57 : vector<1x128xf32> to vector<32x128xf32>
    %59 = arith.addf %56, %58 : vector<32x128xf32>
    %c0_41 = arith.constant 0 : index
    %c0_42 = arith.constant 0 : index
    %60 = vector.load %arg18[%c0_41, %c0_42] : memref<32x128xf32, #tpu.memory_space<vmem>>, vector<32x128xf32>
    tpu.vector_store %arg18[%c0_41, %c0_42], %59 {strides = array<i32>} : memref<32x128xf32, #tpu.memory_space<vmem>>, vector<32x128xf32>,
    return
  }
  func.func @transform_0(%arg0: i32) -> (i32, i32) {
    %c0_i32 = arith.constant 0 : i32
    %c0_i32_0 = arith.constant 0 : i32
    return %arg0, %c0_i32 : i32, i32
  }
  func.func @transform_1(%arg0: i32) -> (i32, i32) {
    %c0_i32 = arith.constant 0 : i32
    %c0_i32_0 = arith.constant 0 : i32
    %c0_i32_1 = arith.constant 0 : i32
    return %c0_i32, %c0_i32_0 : i32, i32
  }
  func.func @transform_2(%arg0: i32) -> (i32, i32) {
    %c0_i32 = arith.constant 0 : i32
    %c0_i32_0 = arith.constant 0 : i32
    %c0_i32_1 = arith.constant 0 : i32
    return %c0_i32, %c0_i32_0 : i32, i32
  }
  func.func @transform_3(%arg0: i32) -> (i32, i32) {
    %c0_i32 = arith.constant 0 : i32
    %c0_i32_0 = arith.constant 0 : i32
    %c0_i32_1 = arith.constant 0 : i32
    return %c0_i32, %c0_i32_0 : i32, i32
  }
  func.func @transform_4(%arg0: i32) -> (i32, i32) {
    %c0_i32 = arith.constant 0 : i32
    %c0_i32_0 = arith.constant 0 : i32
    return %arg0, %c0_i32 : i32, i32
  }
  func.func @transform_5(%arg0: i32) -> (i32, i32) {
    %c0_i32 = arith.constant 0 : i32
    %c0_i32_0 = arith.constant 0 : i32
    %c0_i32_1 = arith.constant 0 : i32
    return %c0_i32, %c0_i32_0 : i32, i32
  }
  func.func @transform_6(%arg0: i32) -> (i32, i32) {
    %c0_i32 = arith.constant 0 : i32
    %c0_i32_0 = arith.constant 0 : i32
    %c0_i32_1 = arith.constant 0 : i32
    return %c0_i32, %c0_i32_0 : i32, i32
  }
  func.func @transform_7(%arg0: i32) -> (i32, i32) {
    %c0_i32 = arith.constant 0 : i32
    %c0_i32_0 = arith.constant 0 : i32
    %c0_i32_1 = arith.constant 0 : i32
    return %c0_i32, %c0_i32_0 : i32, i32
  }
  func.func @transform_8(%arg0: i32) -> (i32, i32) {
    %c0_i32 = arith.constant 0 : i32
    %c0_i32_0 = arith.constant 0 : i32
    return %arg0, %c0_i32 : i32, i32
  }
  func.func @transform_9(%arg0: i32) -> (i32, i32) {
    %c0_i32 = arith.constant 0 : i32
    %c0_i32_0 = arith.constant 0 : i32
    %c0_i32_1 = arith.constant 0 : i32
    return %c0_i32, %c0_i32_0 : i32, i32
  }
  func.func @transform_10(%arg0: i32) -> (i32, i32) {
    %c0_i32 = arith.constant 0 : i32
    %c0_i32_0 = arith.constant 0 : i32
    %c0_i32_1 = arith.constant 0 : i32
    return %c0_i32, %c0_i32_0 : i32, i32
  }
  func.func @transform_11(%arg0: i32) -> (i32, i32) {
    %c0_i32 = arith.constant 0 : i32
    %c0_i32_0 = arith.constant 0 : i32
    %c0_i32_1 = arith.constant 0 : i32
    return %c0_i32, %c0_i32_0 : i32, i32
  }
  func.func @transform_12(%arg0: i32) -> (i32, i32) {
    %c0_i32 = arith.constant 0 : i32
    %c0_i32_0 = arith.constant 0 : i32
    return %arg0, %c0_i32 : i32, i32
  }
  func.func @transform_13(%arg0: i32) -> (i32, i32) {
    %c0_i32 = arith.constant 0 : i32
    %c0_i32_0 = arith.constant 0 : i32
    %c0_i32_1 = arith.constant 0 : i32
    return %c0_i32, %c0_i32_0 : i32, i32
  }
  func.func @transform_14(%arg0: i32) -> (i32, i32) {
    %c0_i32 = arith.constant 0 : i32
    %c0_i32_0 = arith.constant 0 : i32
    %c0_i32_1 = arith.constant 0 : i32
    return %c0_i32, %c0_i32_0 : i32, i32
  }
  func.func @transform_15(%arg0: i32) -> (i32, i32) {
    %c0_i32 = arith.constant 0 : i32
    %c0_i32_0 = arith.constant 0 : i32
    %c0_i32_1 = arith.constant 0 : i32
    return %c0_i32, %c0_i32_0 : i32, i32
  }
  func.func @transform_16(%arg0: i32) -> (i32, i32) {
    %c0_i32 = arith.constant 0 : i32
    %c0_i32_0 = arith.constant 0 : i32
    %c0_i32_1 = arith.constant 0 : i32
    return %c0_i32, %c0_i32_0 : i32, i32
  }
  func.func @transform_17(%arg0: i32) -> (i32, i32) {
    %c0_i32 = arith.constant 0 : i32
    %c0_i32_0 = arith.constant 0 : i32
    return %arg0, %c0_i32 : i32, i32
  }
}

module attributes {stable_mosaic.version = 11 : i64} {
  func.func @_phase_mid_kernel(%arg0: i32, %arg1: memref<32x128xbf16, #tpu.memory_space<vmem>>, %arg2: memref<1x128xf32, #tpu.memory_space<vmem>>, %arg3: memref<1x128xf32, #tpu.memory_space<vmem>>, %arg4: memref<128x128xbf16, #tpu.memory_space<vmem>>, %arg5: memref<32x128xbf16, #tpu.memory_space<vmem>>, %arg6: memref<1x128xf32, #tpu.memory_space<vmem>>, %arg7: memref<1x128xf32, #tpu.memory_space<vmem>>, %arg8: memref<128x128xbf16, #tpu.memory_space<vmem>>, %arg9: memref<32x128xbf16, #tpu.memory_space<vmem>>, %arg10: memref<32x128xbf16, #tpu.memory_space<vmem>>, %arg11: memref<1x8x128xf32, #tpu.memory_space<vmem>>, %arg12: memref<1x8x128xf32, #tpu.memory_space<vmem>>) attributes {dimension_semantics = [#tpu.dimension_semantics<parallel>], iteration_bounds = array<i64: 1>, scalar_prefetch = 0 : i64, scratch_operands = 0 : i64, tpu.core_type = #tpu.core_type<tc>, window_params = [{transform_indices = @transform_0, window_bounds = array<i64: 32, 128>}, {pipeline_mode = #tpu.pipeline_mode<synchronous>, transform_indices = @transform_1, window_bounds = array<i64: 1, 128>}, {pipeline_mode = #tpu.pipeline_mode<synchronous>, transform_indices = @transform_2, window_bounds = array<i64: 1, 128>}, {pipeline_mode = #tpu.pipeline_mode<synchronous>, transform_indices = @transform_3, window_bounds = array<i64: 128, 128>}, {transform_indices = @transform_4, window_bounds = array<i64: 32, 128>}, {pipeline_mode = #tpu.pipeline_mode<synchronous>, transform_indices = @transform_5, window_bounds = array<i64: 1, 128>}, {pipeline_mode = #tpu.pipeline_mode<synchronous>, transform_indices = @transform_6, window_bounds = array<i64: 1, 128>}, {pipeline_mode = #tpu.pipeline_mode<synchronous>, transform_indices = @transform_7, window_bounds = array<i64: 128, 128>}, {transform_indices = @transform_8, window_bounds = array<i64: 32, 128>}, {transform_indices = @transform_9, window_bounds = array<i64: 32, 128>}, {transform_indices = @transform_10, window_bounds = array<i64: 1, 8, 128>}, {transform_indices = @transform_11, window_bounds = array<i64: 1, 8, 128>}]} {
    %c0 = arith.constant 0 : index
    %c0_0 = arith.constant 0 : index
    %0 = vector.load %arg1[%c0, %c0_0] : memref<32x128xbf16, #tpu.memory_space<vmem>>, vector<32x128xbf16>
    %1 = arith.extf %0 : vector<32x128xbf16> to vector<32x128xf32>
    %c0_1 = arith.constant 0 : index
    %c0_2 = arith.constant 0 : index
    %2 = vector.load %arg2[%c0_1, %c0_2] : memref<1x128xf32, #tpu.memory_space<vmem>>, vector<1x128xf32>
    %3 = vector.broadcast %2 : vector<1x128xf32> to vector<32x128xf32>
    %4 = arith.mulf %1, %3 : vector<32x128xf32>
    %c0_3 = arith.constant 0 : index
    %c0_4 = arith.constant 0 : index
    %5 = vector.load %arg3[%c0_3, %c0_4] : memref<1x128xf32, #tpu.memory_space<vmem>>, vector<1x128xf32>
    %6 = vector.broadcast %5 : vector<1x128xf32> to vector<32x128xf32>
    %7 = arith.addf %4, %6 : vector<32x128xf32>
    %cst = arith.constant 0.000000e+00 : f32
    %8 = vector.broadcast %cst : f32 to vector<32x128xf32>
    %9 = arith.maximumf %7, %8 : vector<32x128xf32>
    %10 = arith.truncf %9 : vector<32x128xf32> to vector<32x128xbf16>
    %c0_5 = arith.constant 0 : index
    %c0_6 = arith.constant 0 : index
    %11 = vector.load %arg4[%c0_5, %c0_6] : memref<128x128xbf16, #tpu.memory_space<vmem>>, vector<128x128xbf16>
    %cst_7 = arith.constant dense<0.000000e+00> : vector<32x128xf32>
    %12 = tpu.matmul %10, %11, %cst_7 {dimension_numbers = #tpu.dot_dimension_numbers<[1], [0], [0], [1], [0, 0, 1, 1], [], []>} : vector<32x128xbf16>, vector<128x128xbf16>, vector<32x128xf32> -> vector<32x128xf32>
    %13 = arith.truncf %12 : vector<32x128xf32> to vector<32x128xbf16>
    %c0_8 = arith.constant 0 : index
    %c0_9 = arith.constant 0 : index
    %14 = vector.load %arg9[%c0_8, %c0_9] : memref<32x128xbf16, #tpu.memory_space<vmem>>, vector<32x128xbf16>
    tpu.vector_store %arg9[%c0_8, %c0_9], %13 {strides = array<i32>} : memref<32x128xbf16, #tpu.memory_space<vmem>>, vector<32x128xbf16>,
    %15 = arith.extf %13 : vector<32x128xbf16> to vector<32x128xf32>
    %cst_10 = arith.constant dense<0.000000e+00> : vector<128xf32>
    %16 = vector.multi_reduction <add>, %15, %cst_10 [0] : vector<32x128xf32> to vector<128xf32>
    %17 = vector.shape_cast %16 : vector<128xf32> to vector<1x128xf32>
    %18 = arith.mulf %15, %15 : vector<32x128xf32>
    %cst_11 = arith.constant dense<0.000000e+00> : vector<128xf32>
    %19 = vector.multi_reduction <add>, %18, %cst_11 [0] : vector<32x128xf32> to vector<128xf32>
    %20 = vector.shape_cast %19 : vector<128xf32> to vector<1x128xf32>
    %21 = tpu.iota {dimensions = array<i32: 0>} : vector<8x128xi32>
    %c0_i32 = arith.constant 0 : i32
    %22 = vector.broadcast %c0_i32 : i32 to vector<8x128xi32>
    %23 = arith.cmpi eq, %21, %22 : vector<8x128xi32>
    %24 = vector.shape_cast %17 : vector<1x128xf32> to vector<1x128xf32>
    %25 = vector.broadcast %24 : vector<1x128xf32> to vector<8x128xf32>
    %c1_i32 = arith.constant 1 : i32
    %26 = vector.broadcast %c1_i32 : i32 to vector<8x128xi32>
    %27 = arith.cmpi eq, %21, %26 : vector<8x128xi32>
    %28 = vector.shape_cast %20 : vector<1x128xf32> to vector<1x128xf32>
    %29 = vector.broadcast %28 : vector<1x128xf32> to vector<8x128xf32>
    %cst_12 = arith.constant 0.000000e+00 : f32
    %30 = vector.broadcast %cst_12 : f32 to vector<8x128xf32>
    %31 = arith.select %27, %29, %30 : vector<8x128xi1>, vector<8x128xf32>
    %32 = arith.select %23, %25, %31 : vector<8x128xi1>, vector<8x128xf32>
    %33 = vector.shape_cast %32 : vector<8x128xf32> to vector<1x8x128xf32>
    %c0_13 = arith.constant 0 : index
    %c0_14 = arith.constant 0 : index
    %c0_15 = arith.constant 0 : index
    %34 = vector.load %arg11[%c0_13, %c0_14, %c0_15] : memref<1x8x128xf32, #tpu.memory_space<vmem>>, vector<1x8x128xf32>
    tpu.vector_store %arg11[%c0_13, %c0_14, %c0_15], %33 {strides = array<i32>} : memref<1x8x128xf32, #tpu.memory_space<vmem>>, vector<1x8x128xf32>,
    %c0_16 = arith.constant 0 : index
    %c0_17 = arith.constant 0 : index
    %35 = vector.load %arg5[%c0_16, %c0_17] : memref<32x128xbf16, #tpu.memory_space<vmem>>, vector<32x128xbf16>
    %36 = arith.extf %35 : vector<32x128xbf16> to vector<32x128xf32>
    %c0_18 = arith.constant 0 : index
    %c0_19 = arith.constant 0 : index
    %37 = vector.load %arg6[%c0_18, %c0_19] : memref<1x128xf32, #tpu.memory_space<vmem>>, vector<1x128xf32>
    %38 = vector.broadcast %37 : vector<1x128xf32> to vector<32x128xf32>
    %39 = arith.mulf %36, %38 : vector<32x128xf32>
    %c0_20 = arith.constant 0 : index
    %c0_21 = arith.constant 0 : index
    %40 = vector.load %arg7[%c0_20, %c0_21] : memref<1x128xf32, #tpu.memory_space<vmem>>, vector<1x128xf32>
    %41 = vector.broadcast %40 : vector<1x128xf32> to vector<32x128xf32>
    %42 = arith.addf %39, %41 : vector<32x128xf32>
    %cst_22 = arith.constant 0.000000e+00 : f32
    %43 = vector.broadcast %cst_22 : f32 to vector<32x128xf32>
    %44 = arith.maximumf %42, %43 : vector<32x128xf32>
    %45 = arith.truncf %44 : vector<32x128xf32> to vector<32x128xbf16>
    %c0_23 = arith.constant 0 : index
    %c0_24 = arith.constant 0 : index
    %46 = vector.load %arg8[%c0_23, %c0_24] : memref<128x128xbf16, #tpu.memory_space<vmem>>, vector<128x128xbf16>
    %cst_25 = arith.constant dense<0.000000e+00> : vector<32x128xf32>
    %47 = tpu.matmul %45, %46, %cst_25 {dimension_numbers = #tpu.dot_dimension_numbers<[1], [0], [0], [1], [0, 0, 1, 1], [], []>} : vector<32x128xbf16>, vector<128x128xbf16>, vector<32x128xf32> -> vector<32x128xf32>
    %48 = arith.truncf %47 : vector<32x128xf32> to vector<32x128xbf16>
    %c0_26 = arith.constant 0 : index
    %c0_27 = arith.constant 0 : index
    %49 = vector.load %arg10[%c0_26, %c0_27] : memref<32x128xbf16, #tpu.memory_space<vmem>>, vector<32x128xbf16>
    tpu.vector_store %arg10[%c0_26, %c0_27], %48 {strides = array<i32>} : memref<32x128xbf16, #tpu.memory_space<vmem>>, vector<32x128xbf16>,
    %50 = arith.extf %48 : vector<32x128xbf16> to vector<32x128xf32>
    %cst_28 = arith.constant dense<0.000000e+00> : vector<128xf32>
    %51 = vector.multi_reduction <add>, %50, %cst_28 [0] : vector<32x128xf32> to vector<128xf32>
    %52 = vector.shape_cast %51 : vector<128xf32> to vector<1x128xf32>
    %53 = arith.mulf %50, %50 : vector<32x128xf32>
    %cst_29 = arith.constant dense<0.000000e+00> : vector<128xf32>
    %54 = vector.multi_reduction <add>, %53, %cst_29 [0] : vector<32x128xf32> to vector<128xf32>
    %55 = vector.shape_cast %54 : vector<128xf32> to vector<1x128xf32>
    %56 = tpu.iota {dimensions = array<i32: 0>} : vector<8x128xi32>
    %c0_i32_30 = arith.constant 0 : i32
    %57 = vector.broadcast %c0_i32_30 : i32 to vector<8x128xi32>
    %58 = arith.cmpi eq, %56, %57 : vector<8x128xi32>
    %59 = vector.shape_cast %52 : vector<1x128xf32> to vector<1x128xf32>
    %60 = vector.broadcast %59 : vector<1x128xf32> to vector<8x128xf32>
    %c1_i32_31 = arith.constant 1 : i32
    %61 = vector.broadcast %c1_i32_31 : i32 to vector<8x128xi32>
    %62 = arith.cmpi eq, %56, %61 : vector<8x128xi32>
    %63 = vector.shape_cast %55 : vector<1x128xf32> to vector<1x128xf32>
    %64 = vector.broadcast %63 : vector<1x128xf32> to vector<8x128xf32>
    %cst_32 = arith.constant 0.000000e+00 : f32
    %65 = vector.broadcast %cst_32 : f32 to vector<8x128xf32>
    %66 = arith.select %62, %64, %65 : vector<8x128xi1>, vector<8x128xf32>
    %67 = arith.select %58, %60, %66 : vector<8x128xi1>, vector<8x128xf32>
    %68 = vector.shape_cast %67 : vector<8x128xf32> to vector<1x8x128xf32>
    %c0_33 = arith.constant 0 : index
    %c0_34 = arith.constant 0 : index
    %c0_35 = arith.constant 0 : index
    %69 = vector.load %arg12[%c0_33, %c0_34, %c0_35] : memref<1x8x128xf32, #tpu.memory_space<vmem>>, vector<1x8x128xf32>
    tpu.vector_store %arg12[%c0_33, %c0_34, %c0_35], %68 {strides = array<i32>} : memref<1x8x128xf32, #tpu.memory_space<vmem>>, vector<1x8x128xf32>,
    return
  }
  func.func @transform_0(%arg0: i32) -> (i32, i32) {
    %c0_i32 = arith.constant 0 : i32
    %c0_i32_0 = arith.constant 0 : i32
    return %arg0, %c0_i32 : i32, i32
  }
  func.func @transform_1(%arg0: i32) -> (i32, i32) {
    %c0_i32 = arith.constant 0 : i32
    %c0_i32_0 = arith.constant 0 : i32
    %c0_i32_1 = arith.constant 0 : i32
    return %c0_i32, %c0_i32_0 : i32, i32
  }
  func.func @transform_2(%arg0: i32) -> (i32, i32) {
    %c0_i32 = arith.constant 0 : i32
    %c0_i32_0 = arith.constant 0 : i32
    %c0_i32_1 = arith.constant 0 : i32
    return %c0_i32, %c0_i32_0 : i32, i32
  }
  func.func @transform_3(%arg0: i32) -> (i32, i32) {
    %c0_i32 = arith.constant 0 : i32
    %c0_i32_0 = arith.constant 0 : i32
    %c0_i32_1 = arith.constant 0 : i32
    return %c0_i32, %c0_i32_0 : i32, i32
  }
  func.func @transform_4(%arg0: i32) -> (i32, i32) {
    %c0_i32 = arith.constant 0 : i32
    %c0_i32_0 = arith.constant 0 : i32
    return %arg0, %c0_i32 : i32, i32
  }
  func.func @transform_5(%arg0: i32) -> (i32, i32) {
    %c0_i32 = arith.constant 0 : i32
    %c0_i32_0 = arith.constant 0 : i32
    %c0_i32_1 = arith.constant 0 : i32
    return %c0_i32, %c0_i32_0 : i32, i32
  }
  func.func @transform_6(%arg0: i32) -> (i32, i32) {
    %c0_i32 = arith.constant 0 : i32
    %c0_i32_0 = arith.constant 0 : i32
    %c0_i32_1 = arith.constant 0 : i32
    return %c0_i32, %c0_i32_0 : i32, i32
  }
  func.func @transform_7(%arg0: i32) -> (i32, i32) {
    %c0_i32 = arith.constant 0 : i32
    %c0_i32_0 = arith.constant 0 : i32
    %c0_i32_1 = arith.constant 0 : i32
    return %c0_i32, %c0_i32_0 : i32, i32
  }
  func.func @transform_8(%arg0: i32) -> (i32, i32) {
    %c0_i32 = arith.constant 0 : i32
    %c0_i32_0 = arith.constant 0 : i32
    return %arg0, %c0_i32 : i32, i32
  }
  func.func @transform_9(%arg0: i32) -> (i32, i32) {
    %c0_i32 = arith.constant 0 : i32
    %c0_i32_0 = arith.constant 0 : i32
    return %arg0, %c0_i32 : i32, i32
  }
  func.func @transform_10(%arg0: i32) -> (i32, i32, i32) {
    %c0_i32 = arith.constant 0 : i32
    %c0_i32_0 = arith.constant 0 : i32
    %c0_i32_1 = arith.constant 0 : i32
    return %arg0, %c0_i32, %c0_i32_0 : i32, i32, i32
  }
  func.func @transform_11(%arg0: i32) -> (i32, i32, i32) {
    %c0_i32 = arith.constant 0 : i32
    %c0_i32_0 = arith.constant 0 : i32
    %c0_i32_1 = arith.constant 0 : i32
    return %arg0, %c0_i32, %c0_i32_0 : i32, i32, i32
  }
}

</mosaic_0001>

<bundles_post_ra>
// kernel: face_recon_forward.7
= control target key start
LH: loop header
LB: loop body
LE: loop exit
PB: predicated region body
PF: predicated region fallthrough
CT: control target
= control target key end

     0   :  { %s654_s2 = inlined_call_operand.vmem [shape: bf16[128,128], index: 2, kind: input, shape index: {}]   ;;  %s655_s3 = inlined_call_operand.vmem [shape: bf16[128,128], index: 3, kind: input, shape index: {}]   ;;  %s656_s0 = inlined_call_operand.vmem [shape: bf16[32,128], index: 0, kind: input, shape index: {}]   ;;  %s657_s1 = inlined_call_operand.vmem [shape: bf16[32,128], index: 1, kind: input, shape index: {}]   ;;  %s658_s4 = inlined_call_operand.vmem [shape: bf16[32,128], index: 4, kind: output, shape index: {0}]   ;;  %s659_s5 = inlined_call_operand.vmem [shape: bf16[32,128], index: 5, kind: output, shape index: {1}]   ;;  %s660_s6 = inlined_call_operand.vmem [shape: f32[1,8,128], index: 6, kind: output, shape index: {2}]   ;;  %s661_s7 = inlined_call_operand.vmem [shape: f32[1,8,128], index: 7, kind: output, shape index: {3}]  }
   0x1   :  { %v516_v0 = vld [vmem:[%s654_s2] sm:$0xff]   ;;  %v518_v2 = vld [vmem:[%s654_s2 + $0x8] sm:$0xff]   ;;  %v520_v4 = vld [vmem:[%s654_s2 + $0x10] sm:$0xff]  }
   0x2   :  { %v517_v1 = vld [vmem:[%s655_s3] sm:$0xff]   ;;  %476 = vmatprep.subr.bf16.mxu0 %v516_v0  ;;  %v519_v3 = vld [vmem:[%s655_s3 + $0x8] sm:$0xff]   ;;  %v521_v5 = vld [vmem:[%s655_s3 + $0x10] sm:$0xff]  }
   0x3   :  { %496 = vmatprep.subr.bf16.mxu1 %v517_v1  ;;  %477 = vmatpush3.bf16.msra.mxu0 %v516_v0  ;;  %v522_v6 = vld [vmem:[%s654_s2 + $0x18] sm:$0xff]   ;;  %v524_v8 = vld [vmem:[%s654_s2 + $0x20] sm:$0xff]   ;;  %v526_v10 = vld [vmem:[%s654_s2 + $0x28] sm:$0xff]  }
   0x4   :  { %497 = vmatpush3.bf16.msra.mxu1 %v517_v1  ;;  %478 = vmatprep.subr.bf16.mxu0 %v518_v2  ;;  %v523_v7 = vld [vmem:[%s655_s3 + $0x18] sm:$0xff]   ;;  %v525_v9 = vld [vmem:[%s655_s3 + $0x20] sm:$0xff]   ;;  %v527_v11 = vld [vmem:[%s655_s3 + $0x28] sm:$0xff]  }
   0x5   :  { %498 = vmatprep.subr.bf16.mxu1 %v519_v3  ;;  %v532_v12 = vld [vmem:[%s656_s0] sm:$0xff]   ;;  %v528_v14 = vld [vmem:[%s654_s2 + $0x30] sm:$0xff]   ;;  %v530_v16 = vld [vmem:[%s654_s2 + $0x38] sm:$0xff]  }
   0x6   :  { %v533_v13 = vld [vmem:[%s657_s1] sm:$0xff]   ;;  %492 = vmatprep.mubr.bf16.mxu0 %v532_v12  ;;  %v529_v15 = vld [vmem:[%s655_s3 + $0x30] sm:$0xff]   ;;  %v531_v17 = vld [vmem:[%s655_s3 + $0x38] sm:$0xff]  }
   0x7   :  { %479 = vmatpush3.bf16.msra.mxu0 %v518_v2  ;;  %512 = vmatprep.mubr.bf16.mxu1 %v533_v13  ;;  %v534_v18 = vld [vmem:[%s656_s0 + $0x8] sm:$0xff]  }
   0x8   :  { %499 = vmatpush3.bf16.msra.mxu1 %v519_v3  ;;  %480 = vmatprep.subr.bf16.mxu0 %v520_v4  ;;  %v535_v19 = vld [vmem:[%s657_s1 + $0x8] sm:$0xff]   ;;  %v197_v3 = vlaneseq }
   0x9   :  { %500 = vmatprep.subr.bf16.mxu1 %v521_v5 }
   0xb   :  { %481 = vmatpush3.bf16.msra.mxu0 %v520_v4 }
   0xc   :  { %501 = vmatpush3.bf16.msra.mxu1 %v521_v5  ;;  %482 = vmatprep.subr.bf16.mxu0 %v522_v6 }
   0xd   :  { %502 = vmatprep.subr.bf16.mxu1 %v523_v7 }
   0xf   :  { %483 = vmatpush3.bf16.msra.mxu0 %v522_v6 }
  0x10   :  { %503 = vmatpush3.bf16.msra.mxu1 %v523_v7  ;;  %484 = vmatprep.subr.bf16.mxu0 %v524_v8 }
  0x11   :  { %504 = vmatprep.subr.bf16.mxu1 %v525_v9 }
  0x13   :  { %485 = vmatpush3.bf16.msra.mxu0 %v524_v8 }
  0x14   :  { %505 = vmatpush3.bf16.msra.mxu1 %v525_v9  ;;  %486 = vmatprep.subr.bf16.mxu0 %v526_v10 }
  0x15   :  { %506 = vmatprep.subr.bf16.mxu1 %v527_v11 }
  0x17   :  { %487 = vmatpush3.bf16.msra.mxu0 %v526_v10 }
  0x18   :  { %507 = vmatpush3.bf16.msra.mxu1 %v527_v11  ;;  %488 = vmatprep.subr.bf16.mxu0 %v528_v14  ;;  %v198_v11 = vshrl.u32 %v197_v3, 7 }
  0x19   :  { %508 = vmatprep.subr.bf16.mxu1 %v529_v15 }
  0x1a   :  { %vm200_vm0 = vcmp.eq.s32.totalorder %v198_v11, 1  ;;  %vm199_vm1 = vcmp.eq.s32.totalorder %v198_v11, 0 }
  0x1b   :  { %489 = vmatpush3.bf16.msra.mxu0 %v528_v14 }
  0x1c   :  { %509 = vmatpush3.bf16.msra.mxu1 %v529_v15  ;;  %490 = vmatprep.subr.bf16.mxu0 %v530_v16 }
  0x1d   :  { %510 = vmatprep.subr.bf16.mxu1 %v531_v17 }
  0x1f   :  { %491 = vmatpush3.bf16.msra.mxu0 %v530_v16 }
  0x20   :  { %511 = vmatpush3.bf16.msra.mxu1 %v531_v17 }
  0x22   :  { %493 = vmatmul.mubr.bf16.vlgmr.msra.gmra.mrb[0].mxu0 %v534_v18 }
  0x23   :  { %513 = vmatmul.mubr.bf16.vlgmr.msra.gmra.mrb[0].mxu1 %v535_v19 }
  0xf5   :  { %v494_v20 = vpop.f32.mrb[0].mxu0 }
  0xf6   :  { %v514_v21 = vpop.f32.mrb[0].mxu1  ;;  %v136_v22 = vpop.f32.mrb[1].mxu0 }
  0xf7   :  { %v318_v23 = vpop.f32.mrb[1].mxu1  ;;  %v495_v24 = vpop.f32.mrb[2].mxu0 }
  0xf8   :  { %v152_v25 = vpack.c.bf16 %v495_v24, %v494_v20  ;;  %v515_v26 = vpop.f32.mrb[2].mxu1  ;;  %v139_v27 = vpop.f32.mrb[3].mxu0 }
  0xf9   :  { %v334_v28 = vpack.c.bf16 %v515_v26, %v514_v21  ;;  %v151_v29 = vpack.c.bf16 %v139_v27, %v136_v22  ;;  %v321_v30 = vpop.f32.mrb[3].mxu1 }
  0xfa   :  { %454 = vst [vmem:[%s658_s4 + $0x8] sm:$0xff] %v152_v25   ;;  %v333_v31 = vpack.c.bf16 %v321_v30, %v318_v23  ;;  %v173_v32 = vunpack.c.l.bf16 %v152_v25  ;;  %v174_v38 = vunpack.c.h.bf16 %v152_v25 }
  0xfb   :  { %455 = vst [vmem:[%s659_s5 + $0x8] sm:$0xff] %v334_v28   ;;  %438 = vst [vmem:[%s658_s4] sm:$0xff] %v151_v29   ;;  %v171_v33 = vunpack.c.l.bf16 %v151_v29  ;;  %v172_v34 = vunpack.c.h.bf16 %v151_v29  ;;  %v355_v35 = vunpack.c.l.bf16 %v334_v28  ;;  %v356_v39 = vunpack.c.h.bf16 %v334_v28 }
  0xfc   :  { %448 = vst [vmem:[%s659_s5] sm:$0xff] %v333_v31   ;;  %v353_v36 = vunpack.c.l.bf16 %v333_v31  ;;  %v354_v37 = vunpack.c.h.bf16 %v333_v31  ;;  %v186_v46 = vmul.f32 %v173_v32, %v173_v32  ;;  %v187_v52 = vmul.f32 %v174_v38, %v174_v38 }
  0xfd   :  { %v175_v40 = vadd.f32 %v172_v34, %v171_v33  ;;  %v184_v41 = vmul.f32 %v171_v33, %v171_v33  ;;  %v185_v42 = vmul.f32 %v172_v34, %v172_v34  ;;  %v368_v48 = vmul.f32 %v355_v35, %v355_v35 }
  0xfe   :  { %v357_v43 = vadd.f32 %v354_v37, %v353_v36  ;;  %v366_v44 = vmul.f32 %v353_v36, %v353_v36  ;;  %v367_v45 = vmul.f32 %v354_v37, %v354_v37  ;;  %v369_v54 = vmul.f32 %v356_v39, %v356_v39 }
  0xff   :  { %v176_v47 = vadd.f32 %v175_v40, %v173_v32  ;;  %v188_v49 = vadd.f32 %v185_v42, %v184_v41 }
 0x100   :  { %v358_v50 = vadd.f32 %v357_v43, %v355_v35  ;;  %v370_v51 = vadd.f32 %v367_v45, %v366_v44 }
 0x101   :  { %v177_v53 = vadd.f32 %v176_v47, %v174_v38  ;;  %v189_v55 = vadd.f32 %v188_v49, %v186_v46 }
 0x102   :  { %v359_v56 = vadd.f32 %v358_v50, %v356_v39  ;;  %v371_v57 = vadd.f32 %v370_v51, %v368_v48 }
 0x103   :  { %v178_v58 = vrot.slane %v177_v53, 4  ;;  %v190_v59 = vadd.f32 %v189_v55, %v187_v52 }
 0x104   :  { %v360_v60 = vrot.slane %v359_v56, 4  ;;  %v372_v61 = vadd.f32 %v371_v57, %v369_v54 }
 0x105   :  { %v179_v62 = vadd.f32 %v178_v58, %v177_v53  ;;  %v191_v63 = vrot.slane %v190_v59, 4 }
 0x106   :  { %v361_v0 = vadd.f32 %v360_v60, %v359_v56  ;;  %v373_v1 = vrot.slane %v372_v61, 4 }
 0x107   :  { %v180_v2 = vrot.slane %v179_v62, 2  ;;  %v192_v4 = vadd.f32 %v191_v63, %v190_v59 }
 0x108   :  { %v362_v5 = vrot.slane %v361_v0, 2  ;;  %v374_v6 = vadd.f32 %v373_v1, %v372_v61 }
 0x109   :  { %v181_v7 = vadd.f32 %v180_v2, %v179_v62  ;;  %v193_v8 = vrot.slane %v192_v4, 2 }
 0x10a   :  { %v363_v9 = vadd.f32 %v362_v5, %v361_v0  ;;  %v375_v10 = vrot.slane %v374_v6, 2 }
 0x10b   :  { %v194_v12 = vadd.f32 %v193_v8, %v192_v4  ;;  %v182_v14 = vrot.slane %v181_v7, 1 }
 0x10c   :  { %v376_v13 = vadd.f32 %v375_v10, %v374_v6  ;;  %v364_v15 = vrot.slane %v363_v9, 1 }
 0x10d   :  { %v195_v16 = vrot.slane %v194_v12, 1  ;;  %v183_v20 = vadd.f32 %v182_v14, %v181_v7 }
 0x10e   :  { %v377_v17 = vrot.slane %v376_v13, 1  ;;  %v365_v21 = vadd.f32 %v364_v15, %v363_v9 }
 0x10f   :  { %v196_v18 = vadd.f32 %v195_v16, %v194_v12 }
 0x110   :  { %v378_v19 = vadd.f32 %v377_v17, %v376_v13 }
 0x111   :  { %v201_v22 = vsel %vm200_vm0, %v196_v18, 0.0 }
 0x112   :  { %v379_v23 = vsel %vm200_vm0, %v378_v19, 0.0  ;;  %v202_v24 = vsel %vm199_vm1, %v183_v20, %v201_v22 }
 0x113   :  { %v380_v25 = vsel %vm199_vm1, %v365_v21, %v379_v23  ;;  %203 = vst [vmem:[%s660_s6] sm:$0xff] %v202_v24 }
 0x114   :  { %381 = vst [vmem:[%s661_s7] sm:$0xff] %v380_v25 }

// kernel: face_recon_forward.13
= control target key start
LH: loop header
LB: loop body
LE: loop exit
PB: predicated region body
PF: predicated region fallthrough
CT: control target
= control target key end

     0   :  { %s1174_s7 = inlined_call_operand.vmem [shape: bf16[128,128], index: 7, kind: input, shape index: {}]   ;;  %s1175_s11 = inlined_call_operand.vmem [shape: bf16[128,128], index: 11, kind: input, shape index: {}]   ;;  %s1176_s4 = inlined_call_operand.vmem [shape: bf16[32,128], index: 4, kind: input, shape index: {}]   ;;  %s1177_s5 = inlined_call_operand.vmem [shape: f32[1,128], index: 5, kind: input, shape index: {}]   ;;  %s1178_s6 = inlined_call_operand.vmem [shape: f32[1,128], index: 6, kind: input, shape index: {}]   ;;  %s1179_s8 = inlined_call_operand.vmem [shape: bf16[32,128], index: 8, kind: input, shape index: {}]   ;;  %s1180_s3 = inlined_call_operand.vmem [shape: bf16[128,128], index: 3, kind: input, shape index: {}]   ;;  %s1181_s9 = inlined_call_operand.vmem [shape: f32[1,128], index: 9, kind: input, shape index: {}]   ;;  %s1182_s10 = inlined_call_operand.vmem [shape: f32[1,128], index: 10, kind: input, shape index: {}]   ;;  %s1183_s15 = inlined_call_operand.vmem [shape: bf16[128,128], index: 15, kind: input, shape index: {}]   ;;  %s1184_s0 = inlined_call_operand.vmem [shape: bf16[32,128], index: 0, kind: input, shape index: {}]   ;;  %s1185_s1 = inlined_call_operand.vmem [shape: f32[1,128], index: 1, kind: input, shape index: {}]   ;;  %s1186_s12 = inlined_call_operand.vmem [shape: bf16[32,128], index: 12, kind: input, shape index: {}]   ;;  %s1187_s2 = inlined_call_operand.vmem [shape: f32[1,128], index: 2, kind: input, shape index: {}]   ;;  %s1188_s13 = inlined_call_operand.vmem [shape: f32[1,128], index: 13, kind: input, shape index: {}]   ;;  %s1189_s14 = inlined_call_operand.vmem [shape: f32[1,128], index: 14, kind: input, shape index: {}]   ;;  %s1190_s16 = inlined_call_operand.vmem [shape: f32[1,128], index: 16, kind: input, shape index: {}]   ;;  %s1191_s17 = inlined_call_operand.vmem [shape: f32[32,128], index: 17, kind: output, shape index: {}]  }
   0x1   :  { %1195 = sst [smem:[#allocation2_spill]] %s1174_s7  ;;  %v734_v11 = vld [vmem:[%s1176_s4] sm:$0xff]   ;;  %v758_v12 = vld [vmem:[%s1176_s4 + $0x8] sm:$0xff]  }
   0x2   :  { %1196 = sst [smem:[#allocation3_spill]] %s1175_s11  ;;  %s1198_s26 = sld [smem:[#allocation2_spill]]  ;;  %v686_v13 = vld [vmem:[%s1177_s5] ss:$0 sm:$0xff]  ;;  %v735_v15 = vunpack.c.l.bf16 %v734_v11  ;;  %v736_v16 = vunpack.c.h.bf16 %v734_v11  ;;  %v739_v17 = vunpack.c.l.bf16 %v758_v12  ;;  %v740_v18 = vunpack.c.h.bf16 %v758_v12  ;;  %v759_v21 = vld [vmem:[%s1179_s8 + $0x8] sm:$0xff]  }
   0x3   :  { %1197 = sst [smem:[#allocation4_spill]] %s1186_s12  ;;  %s1199_s12 = sld [smem:[#allocation3_spill]]  ;;  %v687_v19 = vld [vmem:[%s1178_s6] ss:$0 sm:$0xff]  ;;  %v747_v31 = vunpack.c.l.bf16 %v759_v21  ;;  %v748_v32 = vunpack.c.h.bf16 %v759_v21  ;;  %v911_v62 = vld [vmem:[%s1180_s3 + $0x8] sm:$0xff]  }
   0x4   :  { %v742_v20 = vld [vmem:[%s1179_s8] sm:$0xff]   ;;  %v124_v23 = vmul.f32 %v735_v15, %v686_v13  ;;  %v125_v24 = vmul.f32 %v736_v16, %v686_v13  ;;  %v126_v29 = vmul.f32 %v739_v17, %v686_v13  ;;  %v127_v30 = vmul.f32 %v740_v18, %v686_v13  ;;  %v912_v63 = vld [vmem:[%s1183_s15 + $0x8] sm:$0xff]   ;;  %s1200_s8 = sld [smem:[#allocation4_spill]]  ;;  %v915_v16 = vld [vmem:[%s1180_s3 + $0x18] sm:$0xff]  }
   0x5   :  { %v743_v25 = vunpack.c.l.bf16 %v742_v20  ;;  %v744_v26 = vunpack.c.h.bf16 %v742_v20  ;;  %v704_v27 = vld [vmem:[%s1181_s9] ss:$0 sm:$0xff] }
   0x6   :  { %v705_v28 = vld [vmem:[%s1182_s10] ss:$0 sm:$0xff]  ;;  %v135_v34 = vadd.f32 %v687_v19, %v124_v23  ;;  %v136_v35 = vadd.f32 %v687_v19, %v125_v24  ;;  %v137_v38 = vadd.f32 %v687_v19, %v126_v29  ;;  %v138_v39 = vadd.f32 %v687_v19, %v127_v30  ;;  %v916_v19 = vld [vmem:[%s1183_s15 + $0x18] sm:$0xff]   ;;  %v757_v24 = vld [vmem:[%s1184_s0 + $0x8] sm:$0xff]  }
   0x7   :  { %v370_v36 = vmul.f32 %v743_v25, %v704_v27  ;;  %v371_v37 = vmul.f32 %v744_v26, %v704_v27  ;;  %v372_v40 = vmul.f32 %v747_v31, %v704_v27  ;;  %v373_v41 = vmul.f32 %v748_v32, %v704_v27  ;;  %v909_v58 = vld [vmem:[%s1180_s3] sm:$0xff]  }
   0x8   :  { %v893_v0 = vld [vmem:[%s1198_s26] sm:$0xff]   ;;  %v895_v2 = vld [vmem:[%s1198_s26 + $0x8] sm:$0xff]   ;;  %v897_v4 = vld [vmem:[%s1198_s26 + $0x10] sm:$0xff]   ;;  %v139_v43 = vmax.f32 %v135_v34, 0.0  ;;  %v140_v44 = vmax.f32 %v136_v35, 0.0  ;;  %v141_v53 = vmax.f32 %v137_v38, 0.0  ;;  %v731_v32 = vunpack.c.l.bf16 %v757_v24 }
   0x9   :  { %v894_v1 = vld [vmem:[%s1199_s12] sm:$0xff]   ;;  %801 = vmatprep.subr.bf16.mxu1 %v893_v0  ;;  %v896_v3 = vld [vmem:[%s1199_s12 + $0x8] sm:$0xff]   ;;  %v898_v5 = vld [vmem:[%s1199_s12 + $0x10] sm:$0xff]   ;;  %v381_v45 = vadd.f32 %v705_v28, %v370_v36  ;;  %v382_v46 = vadd.f32 %v705_v28, %v371_v37  ;;  %v383_v48 = vadd.f32 %v705_v28, %v372_v40  ;;  %v384_v49 = vadd.f32 %v705_v28, %v373_v41 }
   0xa   :  { %841 = vmatprep.subr.bf16.mxu0 %v894_v1  ;;  %802 = vmatpush3.bf16.msra.mxu1 %v893_v0  ;;  %v899_v6 = vld [vmem:[%s1198_s26 + $0x18] sm:$0xff]   ;;  %v901_v8 = vld [vmem:[%s1198_s26 + $0x20] sm:$0xff]   ;;  %v903_v10 = vld [vmem:[%s1198_s26 + $0x28] sm:$0xff]   ;;  %v143_v50 = vpack.c.bf16 %v140_v44, %v139_v43  ;;  %v142_v54 = vmax.f32 %v138_v39, 0.0 }
   0xb   :  { %842 = vmatpush3.bf16.msra.mxu0 %v894_v1  ;;  %803 = vmatprep.subr.bf16.mxu1 %v895_v2  ;;  %v900_v7 = vld [vmem:[%s1199_s12 + $0x18] sm:$0xff]   ;;  %v902_v9 = vld [vmem:[%s1199_s12 + $0x20] sm:$0xff]   ;;  %v904_v14 = vld [vmem:[%s1199_s12 + $0x28] sm:$0xff]   ;;  %v385_v51 = vmax.f32 %v381_v45, 0.0  ;;  %v386_v52 = vmax.f32 %v382_v46, 0.0  ;;  %v387_v55 = vmax.f32 %v383_v48, 0.0 }
   0xc   :  { %843 = vmatprep.subr.bf16.mxu0 %v896_v3  ;;  %v905_v22 = vld [vmem:[%s1198_s26 + $0x30] sm:$0xff]   ;;  %v907_v42 = vld [vmem:[%s1198_s26 + $0x38] sm:$0xff]   ;;  %v388_v56 = vmax.f32 %v384_v49, 0.0  ;;  %817 = vmatprep.mubr.bf16.mxu1 %v143_v50  ;;  %v910_v59 = vld [vmem:[%s1183_s15] sm:$0xff]   ;;  %v144_v60 = vpack.c.bf16 %v142_v54, %v141_v53 }
   0xd   :  { %v906_v33 = vld [vmem:[%s1199_s12 + $0x30] sm:$0xff]   ;;  %v908_v47 = vld [vmem:[%s1199_s12 + $0x38] sm:$0xff]   ;;  %v389_v57 = vpack.c.bf16 %v386_v52, %v385_v51  ;;  %v726_v0 = vld [vmem:[%s1184_s0] sm:$0xff]  }
   0xe   :  { %804 = vmatpush3.bf16.msra.mxu1 %v895_v2  ;;  %v390_v61 = vpack.c.bf16 %v388_v56, %v387_v55  ;;  %v913_v1 = vld [vmem:[%s1180_s3 + $0x10] sm:$0xff]   ;;  %v727_v2 = vunpack.c.l.bf16 %v726_v0  ;;  %v715_v13 = vld [vmem:[%s1189_s14] ss:$0 sm:$0xff]  ;;  %v760_v29 = vld [vmem:[%s1200_s8 + $0x8] sm:$0xff]  }
   0xf   :  { %844 = vmatpush3.bf16.msra.mxu0 %v896_v3  ;;  %805 = vmatprep.subr.bf16.mxu1 %v897_v4  ;;  %v728_v3 = vunpack.c.h.bf16 %v726_v0  ;;  %v917_v27 = vld [vmem:[%s1180_s3 + $0x20] sm:$0xff]   ;;  %v755_v34 = vunpack.c.l.bf16 %v760_v29  ;;  %v756_v35 = vunpack.c.h.bf16 %v760_v29  ;;  %v919_v36 = vld [vmem:[%s1180_s3 + $0x28] sm:$0xff]   ;;  %v922_v43 = vld [vmem:[%s1183_s15 + $0x30] sm:$0xff]  }
  0x10   :  { %845 = vmatprep.subr.bf16.mxu0 %v898_v5  ;;  %857 = vmatprep.mubr.bf16.mxu0 %v389_v57  ;;  %v918_v30 = vld [vmem:[%s1183_s15 + $0x20] sm:$0xff]   ;;  %v920_v37 = vld [vmem:[%s1183_s15 + $0x28] sm:$0xff]   ;;  %v923_v48 = vld [vmem:[%s1180_s3 + $0x38] sm:$0xff]  }
  0x11   :  { %v924_v49 = vld [vmem:[%s1183_s15 + $0x38] sm:$0xff]  }
  0x12   :  { %806 = vmatpush3.bf16.msra.mxu1 %v897_v4  ;;  %v684_v4 = vld [vmem:[%s1185_s1] ss:$0 sm:$0xff] }
  0x13   :  { %846 = vmatpush3.bf16.msra.mxu0 %v898_v5  ;;  %807 = vmatprep.subr.bf16.mxu1 %v899_v6  ;;  %v750_v5 = vld [vmem:[%s1200_s8] sm:$0xff]   ;;  %v72_v11 = vmul.f32 %v727_v2, %v684_v4  ;;  %v73_v12 = vmul.f32 %v728_v3, %v684_v4  ;;  %v74_v38 = vmul.f32 %v731_v32, %v684_v4 }
  0x14   :  { %847 = vmatprep.subr.bf16.mxu0 %v900_v7 }
  0x16   :  { %808 = vmatpush3.bf16.msra.mxu1 %v899_v6  ;;  %v914_v6 = vld [vmem:[%s1183_s15 + $0x10] sm:$0xff]  }
  0x17   :  { %848 = vmatpush3.bf16.msra.mxu0 %v900_v7  ;;  %809 = vmatprep.subr.bf16.mxu1 %v901_v8  ;;  %v685_v7 = vld [vmem:[%s1187_s2] ss:$0 sm:$0xff] }
  0x18   :  { %849 = vmatprep.subr.bf16.mxu0 %v902_v9  ;;  %v83_v17 = vadd.f32 %v685_v7, %v72_v11  ;;  %v84_v18 = vadd.f32 %v685_v7, %v73_v12  ;;  %v85_v44 = vadd.f32 %v685_v7, %v74_v38 }
  0x1a   :  { %810 = vmatpush3.bf16.msra.mxu1 %v901_v8  ;;  %v751_v8 = vunpack.c.l.bf16 %v750_v5  ;;  %v88_v23 = vmax.f32 %v84_v18, 0.0  ;;  %v89_v50 = vmax.f32 %v85_v44, 0.0 }
  0x1b   :  { %850 = vmatpush3.bf16.msra.mxu0 %v902_v9  ;;  %811 = vmatprep.subr.bf16.mxu1 %v903_v10  ;;  %v752_v9 = vunpack.c.h.bf16 %v750_v5 }
  0x1c   :  { %851 = vmatprep.subr.bf16.mxu0 %v904_v14 }
  0x1e   :  { %812 = vmatpush3.bf16.msra.mxu1 %v903_v10  ;;  %v714_v10 = vld [vmem:[%s1188_s13] ss:$0 sm:$0xff] }
  0x1f   :  { %852 = vmatpush3.bf16.msra.mxu0 %v904_v14  ;;  %813 = vmatprep.subr.bf16.mxu1 %v905_v22  ;;  %v523_v14 = vmul.f32 %v751_v8, %v714_v10  ;;  %v524_v15 = vmul.f32 %v752_v9, %v714_v10  ;;  %v525_v40 = vmul.f32 %v755_v34, %v714_v10 }
  0x20   :  { %853 = vmatprep.subr.bf16.mxu0 %v906_v33  ;;  %v526_v41 = vmul.f32 %v756_v35, %v714_v10 }
  0x21   :  { %v534_v20 = vadd.f32 %v715_v13, %v523_v14  ;;  %v535_v21 = vadd.f32 %v715_v13, %v524_v15  ;;  %v536_v46 = vadd.f32 %v715_v13, %v525_v40 }
  0x22   :  { %814 = vmatpush3.bf16.msra.mxu1 %v905_v22  ;;  %v87_v22 = vmax.f32 %v83_v17, 0.0 }
  0x23   :  { %854 = vmatpush3.bf16.msra.mxu0 %v906_v33  ;;  %815 = vmatprep.subr.bf16.mxu1 %v907_v42  ;;  %v538_v25 = vmax.f32 %v534_v20, 0.0  ;;  %v539_v26 = vmax.f32 %v535_v21, 0.0  ;;  %v732_v33 = vunpack.c.h.bf16 %v757_v24  ;;  %v540_v52 = vmax.f32 %v536_v46, 0.0 }
  0x24   :  { %855 = vmatprep.subr.bf16.mxu0 %v908_v47  ;;  %v91_v28 = vpack.c.bf16 %v88_v23, %v87_v22 }
  0x25   :  { %v542_v31 = vpack.c.bf16 %v539_v26, %v538_v25  ;;  %v75_v39 = vmul.f32 %v732_v33, %v684_v4 }
  0x26   :  { %816 = vmatpush3.bf16.msra.mxu1 %v907_v42  ;;  %v921_v42 = vld [vmem:[%s1180_s3 + $0x30] sm:$0xff]  }
  0x27   :  { %856 = vmatpush3.bf16.msra.mxu0 %v908_v47  ;;  %821 = vmatprep.subr.bf16.mxu1 %v909_v58  ;;  %v86_v45 = vadd.f32 %v685_v7, %v75_v39  ;;  %v537_v47 = vadd.f32 %v715_v13, %v526_v41 }
  0x28   :  { %861 = vmatprep.subr.bf16.mxu0 %v910_v59 }
  0x29   :  { %818 = vmatmul.mubr.bf16.vlgmr.msra.gmra.mrb[0].mxu1 %v144_v60  ;;  %v90_v51 = vmax.f32 %v86_v45, 0.0  ;;  %v541_v53 = vmax.f32 %v537_v47, 0.0 }
  0x2a   :  { %822 = vmatpush3.bf16.msra.mxu1 %v909_v58  ;;  %858 = vmatmul.mubr.bf16.vlgmr.msra.gmra.mrb[0].mxu0 %v390_v61 }
  0x2b   :  { %862 = vmatpush3.bf16.msra.mxu0 %v910_v59  ;;  %823 = vmatprep.subr.bf16.mxu1 %v911_v62  ;;  %v92_v54 = vpack.c.bf16 %v90_v51, %v89_v50  ;;  %v543_v55 = vpack.c.bf16 %v541_v53, %v540_v52 }
  0x2c   :  { %863 = vmatprep.subr.bf16.mxu0 %v912_v63  ;;  %837 = vmatprep.mubr.bf16.mxu1 %v91_v28 }
  0x2d   :  { %877 = vmatprep.mubr.bf16.mxu0 %v542_v31 }
  0x2e   :  { %824 = vmatpush3.bf16.msra.mxu1 %v911_v62  ;;  %v724_v62 = vld [vmem:[%s1190_s16] ss:$0 sm:$0xff] }
  0x2f   :  { %864 = vmatpush3.bf16.msra.mxu0 %v912_v63  ;;  %825 = vmatprep.subr.bf16.mxu1 %v913_v1 }
  0x30   :  { %865 = vmatprep.subr.bf16.mxu0 %v914_v6 }
  0x32   :  { %826 = vmatpush3.bf16.msra.mxu1 %v913_v1 }
  0x33   :  { %866 = vmatpush3.bf16.msra.mxu0 %v914_v6  ;;  %827 = vmatprep.subr.bf16.mxu1 %v915_v16 }
  0x34   :  { %867 = vmatprep.subr.bf16.mxu0 %v916_v19 }
  0x36   :  { %828 = vmatpush3.bf16.msra.mxu1 %v915_v16 }
  0x37   :  { %868 = vmatpush3.bf16.msra.mxu0 %v916_v19  ;;  %829 = vmatprep.subr.bf16.mxu1 %v917_v27 }
  0x38   :  { %869 = vmatprep.subr.bf16.mxu0 %v918_v30 }
  0x3a   :  { %830 = vmatpush3.bf16.msra.mxu1 %v917_v27 }
  0x3b   :  { %870 = vmatpush3.bf16.msra.mxu0 %v918_v30  ;;  %831 = vmatprep.subr.bf16.mxu1 %v919_v36 }
  0x3c   :  { %871 = vmatprep.subr.bf16.mxu0 %v920_v37 }
  0x3e   :  { %832 = vmatpush3.bf16.msra.mxu1 %v919_v36 }
  0x3f   :  { %872 = vmatpush3.bf16.msra.mxu0 %v920_v37  ;;  %833 = vmatprep.subr.bf16.mxu1 %v921_v42 }
  0x40   :  { %873 = vmatprep.subr.bf16.mxu0 %v922_v43 }
  0x42   :  { %834 = vmatpush3.bf16.msra.mxu1 %v921_v42 }
  0x43   :  { %874 = vmatpush3.bf16.msra.mxu0 %v922_v43  ;;  %835 = vmatprep.subr.bf16.mxu1 %v923_v48 }
  0x44   :  { %875 = vmatprep.subr.bf16.mxu0 %v924_v49 }
  0x46   :  { %836 = vmatpush3.bf16.msra.mxu1 %v923_v48 }
  0x47   :  { %876 = vmatpush3.bf16.msra.mxu0 %v924_v49 }
  0x49   :  { %838 = vmatmul.mubr.bf16.vlgmr.msra.gmra.mrb[0].mxu1 %v92_v54 }
  0x4a   :  { %878 = vmatmul.mubr.bf16.vlgmr.msra.gmra.mrb[0].mxu0 %v543_v55 }
 0x11c   :  { %v839_v56 = vpop.f32.mrb[0].mxu1 }
 0x11d   :  { %v879_v57 = vpop.f32.mrb[0].mxu0  ;;  %v340_v58 = vpop.f32.mrb[1].mxu1 }
 0x11e   :  { %v881_v59 = vadd.f32 %v879_v57, %v839_v56  ;;  %v642_v60 = vpop.f32.mrb[1].mxu0  ;;  %v840_v61 = vpop.f32.mrb[2].mxu1 }
 0x11f   :  { %v882_v63 = vadd.f32 %v642_v60, %v340_v58  ;;  %v880_v0 = vpop.f32.mrb[2].mxu0  ;;  %v343_v1 = vpop.f32.mrb[3].mxu1 }
 0x120   :  { %v663_v2 = vmul.f32 0.5, %v881_v59  ;;  %v883_v3 = vadd.f32 %v880_v0, %v840_v61  ;;  %v645_v4 = vpop.f32.mrb[3].mxu0 }
 0x121   :  { %v661_v5 = vmul.f32 0.5, %v882_v63  ;;  %v884_v6 = vadd.f32 %v645_v4, %v343_v1 }
 0x122   :  { %v674_v7 = vadd.f32 %v724_v62, %v663_v2  ;;  %v664_v8 = vmul.f32 0.5, %v883_v3 }
 0x123   :  { %v672_v9 = vadd.f32 %v724_v62, %v661_v5  ;;  %v662_v10 = vmul.f32 0.5, %v884_v6 }
 0x124   :  { %678 = vst [vmem:[%s1191_s17 + $0x10] sm:$0xff] %v674_v7  ;;  %v675_v11 = vadd.f32 %v724_v62, %v664_v8 }
 0x125   :  { %676 = vst [vmem:[%s1191_s17] sm:$0xff] %v672_v9  ;;  %v673_v12 = vadd.f32 %v724_v62, %v662_v10 }
 0x126   :  { %679 = vst [vmem:[%s1191_s17 + $0x18] sm:$0xff] %v675_v11 }
 0x127   :  { %677 = vst [vmem:[%s1191_s17 + $0x8] sm:$0xff] %v673_v12 }

// kernel: face_recon_forward.8
= control target key start
LH: loop header
LB: loop body
LE: loop exit
PB: predicated region body
PF: predicated region fallthrough
CT: control target
= control target key end

     0   :  { %s752_s3 = inlined_call_operand.vmem [shape: bf16[128,128], index: 3, kind: input, shape index: {}]   ;;  %s753_s7 = inlined_call_operand.vmem [shape: bf16[128,128], index: 7, kind: input, shape index: {}]   ;;  %s754_s0 = inlined_call_operand.vmem [shape: bf16[32,128], index: 0, kind: input, shape index: {}]   ;;  %s755_s1 = inlined_call_operand.vmem [shape: f32[1,128], index: 1, kind: input, shape index: {}]   ;;  %s756_s4 = inlined_call_operand.vmem [shape: bf16[32,128], index: 4, kind: input, shape index: {}]   ;;  %s757_s2 = inlined_call_operand.vmem [shape: f32[1,128], index: 2, kind: input, shape index: {}]   ;;  %s758_s5 = inlined_call_operand.vmem [shape: f32[1,128], index: 5, kind: input, shape index: {}]   ;;  %s759_s6 = inlined_call_operand.vmem [shape: f32[1,128], index: 6, kind: input, shape index: {}]   ;;  %s760_s8 = inlined_call_operand.vmem [shape: bf16[32,128], index: 8, kind: output, shape index: {0}]   ;;  %s761_s9 = inlined_call_operand.vmem [shape: bf16[32,128], index: 9, kind: output, shape index: {1}]   ;;  %s762_s10 = inlined_call_operand.vmem [shape: f32[1,8,128], index: 10, kind: output, shape index: {2}]   ;;  %s763_s11 = inlined_call_operand.vmem [shape: f32[1,8,128], index: 11, kind: output, shape index: {3}]  }
   0x1   :  { %v586_v0 = vld [vmem:[%s752_s3] sm:$0xff]   ;;  %v588_v2 = vld [vmem:[%s752_s3 + $0x8] sm:$0xff]   ;;  %v590_v4 = vld [vmem:[%s752_s3 + $0x10] sm:$0xff]  }
   0x2   :  { %v587_v1 = vld [vmem:[%s753_s7] sm:$0xff]   ;;  %546 = vmatprep.subr.bf16.mxu0 %v586_v0  ;;  %v589_v3 = vld [vmem:[%s753_s7 + $0x8] sm:$0xff]   ;;  %v591_v5 = vld [vmem:[%s753_s7 + $0x10] sm:$0xff]  }
   0x3   :  { %566 = vmatprep.subr.bf16.mxu1 %v587_v1  ;;  %547 = vmatpush3.bf16.msra.mxu0 %v586_v0  ;;  %v592_v6 = vld [vmem:[%s752_s3 + $0x18] sm:$0xff]   ;;  %v594_v8 = vld [vmem:[%s752_s3 + $0x20] sm:$0xff]   ;;  %v596_v10 = vld [vmem:[%s752_s3 + $0x28] sm:$0xff]  }
   0x4   :  { %567 = vmatpush3.bf16.msra.mxu1 %v587_v1  ;;  %548 = vmatprep.subr.bf16.mxu0 %v588_v2  ;;  %v593_v7 = vld [vmem:[%s753_s7 + $0x18] sm:$0xff]   ;;  %v595_v9 = vld [vmem:[%s753_s7 + $0x20] sm:$0xff]   ;;  %v522_v12 = vld [vmem:[%s754_s0 + $0x8] sm:$0xff]  }
   0x5   :  { %568 = vmatprep.subr.bf16.mxu1 %v589_v3  ;;  %v487_v11 = vld [vmem:[%s754_s0] sm:$0xff]   ;;  %v597_v14 = vld [vmem:[%s753_s7 + $0x28] sm:$0xff]   ;;  %v492_v19 = vunpack.c.l.bf16 %v522_v12  ;;  %v493_v20 = vunpack.c.h.bf16 %v522_v12  ;;  %v598_v32 = vld [vmem:[%s752_s3 + $0x30] sm:$0xff]  }
   0x6   :  { %v450_v13 = vld [vmem:[%s755_s1] ss:$0 sm:$0xff]  ;;  %v488_v15 = vunpack.c.l.bf16 %v487_v11  ;;  %v489_v16 = vunpack.c.h.bf16 %v487_v11  ;;  %v524_v18 = vld [vmem:[%s756_s4 + $0x8] sm:$0xff]   ;;  %v599_v36 = vld [vmem:[%s753_s7 + $0x30] sm:$0xff]  }
   0x7   :  { %549 = vmatpush3.bf16.msra.mxu0 %v588_v2  ;;  %v505_v17 = vld [vmem:[%s756_s4] sm:$0xff]   ;;  %v510_v25 = vunpack.c.l.bf16 %v524_v18  ;;  %v511_v26 = vunpack.c.h.bf16 %v524_v18  ;;  %v51_v30 = vmul.f32 %v492_v19, %v450_v13  ;;  %v52_v31 = vmul.f32 %v493_v20, %v450_v13  ;;  %v600_v47 = vld [vmem:[%s752_s3 + $0x38] sm:$0xff]  }
   0x8   :  { %569 = vmatpush3.bf16.msra.mxu1 %v589_v3  ;;  %550 = vmatprep.subr.bf16.mxu0 %v590_v4  ;;  %v451_v21 = vld [vmem:[%s757_s2] ss:$0 sm:$0xff]  ;;  %v506_v22 = vunpack.c.l.bf16 %v505_v17  ;;  %v507_v23 = vunpack.c.h.bf16 %v505_v17  ;;  %v49_v27 = vmul.f32 %v488_v15, %v450_v13  ;;  %v50_v28 = vmul.f32 %v489_v16, %v450_v13  ;;  %v601_v51 = vld [vmem:[%s753_s7 + $0x38] sm:$0xff]  }
   0x9   :  { %570 = vmatprep.subr.bf16.mxu1 %v591_v5  ;;  %v464_v24 = vld [vmem:[%s758_s5] ss:$0 sm:$0xff]  ;;  %v62_v39 = vadd.f32 %v451_v21, %v51_v30  ;;  %v63_v42 = vadd.f32 %v451_v21, %v52_v31 }
   0xa   :  { %v465_v29 = vld [vmem:[%s759_s6] ss:$0 sm:$0xff]  ;;  %v251_v33 = vmul.f32 %v506_v22, %v464_v24  ;;  %v252_v34 = vmul.f32 %v507_v23, %v464_v24  ;;  %v253_v35 = vmul.f32 %v510_v25, %v464_v24  ;;  %v60_v37 = vadd.f32 %v451_v21, %v49_v27 }
   0xb   :  { %551 = vmatpush3.bf16.msra.mxu0 %v590_v4  ;;  %v61_v38 = vadd.f32 %v451_v21, %v50_v28  ;;  %v254_v43 = vmul.f32 %v511_v26, %v464_v24  ;;  %v66_v54 = vmax.f32 %v62_v39, 0.0  ;;  %v67_v55 = vmax.f32 %v63_v42, 0.0 }
   0xc   :  { %571 = vmatpush3.bf16.msra.mxu1 %v591_v5  ;;  %552 = vmatprep.subr.bf16.mxu0 %v592_v6  ;;  %v262_v40 = vadd.f32 %v465_v29, %v251_v33  ;;  %v263_v41 = vadd.f32 %v465_v29, %v252_v34  ;;  %v64_v44 = vmax.f32 %v60_v37, 0.0  ;;  %v264_v46 = vadd.f32 %v465_v29, %v253_v35 }
   0xd   :  { %572 = vmatprep.subr.bf16.mxu1 %v593_v7  ;;  %v65_v45 = vmax.f32 %v61_v38, 0.0  ;;  %v265_v50 = vadd.f32 %v465_v29, %v254_v43  ;;  %v69_v58 = vpack.c.bf16 %v67_v55, %v66_v54  ;;  %v229_v43 = vlaneseq }
   0xe   :  { %v266_v48 = vmax.f32 %v262_v40, 0.0  ;;  %v267_v49 = vmax.f32 %v263_v41, 0.0  ;;  %v268_v56 = vmax.f32 %v264_v46, 0.0 }
   0xf   :  { %553 = vmatpush3.bf16.msra.mxu0 %v592_v6  ;;  %v68_v52 = vpack.c.bf16 %v65_v45, %v64_v44  ;;  %v269_v57 = vmax.f32 %v265_v50, 0.0 }
  0x10   :  { %573 = vmatpush3.bf16.msra.mxu1 %v593_v7  ;;  %554 = vmatprep.subr.bf16.mxu0 %v594_v8  ;;  %v270_v53 = vpack.c.bf16 %v267_v49, %v266_v48 }
  0x11   :  { %574 = vmatprep.subr.bf16.mxu1 %v595_v9  ;;  %562 = vmatprep.mubr.bf16.mxu0 %v68_v52  ;;  %v271_v59 = vpack.c.bf16 %v269_v57, %v268_v56 }
  0x12   :  { %582 = vmatprep.mubr.bf16.mxu1 %v270_v53 }
  0x13   :  { %555 = vmatpush3.bf16.msra.mxu0 %v594_v8 }
  0x14   :  { %575 = vmatpush3.bf16.msra.mxu1 %v595_v9  ;;  %556 = vmatprep.subr.bf16.mxu0 %v596_v10 }
  0x15   :  { %576 = vmatprep.subr.bf16.mxu1 %v597_v14 }
  0x17   :  { %557 = vmatpush3.bf16.msra.mxu0 %v596_v10 }
  0x18   :  { %577 = vmatpush3.bf16.msra.mxu1 %v597_v14  ;;  %558 = vmatprep.subr.bf16.mxu0 %v598_v32 }
  0x19   :  { %578 = vmatprep.subr.bf16.mxu1 %v599_v36 }
  0x1b   :  { %559 = vmatpush3.bf16.msra.mxu0 %v598_v32 }
  0x1c   :  { %579 = vmatpush3.bf16.msra.mxu1 %v599_v36  ;;  %560 = vmatprep.subr.bf16.mxu0 %v600_v47 }
  0x1d   :  { %580 = vmatprep.subr.bf16.mxu1 %v601_v51 }
  0x1f   :  { %561 = vmatpush3.bf16.msra.mxu0 %v600_v47 }
  0x20   :  { %581 = vmatpush3.bf16.msra.mxu1 %v601_v51  ;;  %v230_v51 = vshrl.u32 %v229_v43, 7 }
  0x22   :  { %563 = vmatmul.mubr.bf16.vlgmr.msra.gmra.mrb[0].mxu0 %v69_v58  ;;  %vm232_vm0 = vcmp.eq.s32.totalorder %v230_v51, 1  ;;  %vm231_vm1 = vcmp.eq.s32.totalorder %v230_v51, 0 }
  0x23   :  { %583 = vmatmul.mubr.bf16.vlgmr.msra.gmra.mrb[0].mxu1 %v271_v59 }
  0xf5   :  { %v564_v60 = vpop.f32.mrb[0].mxu0 }
  0xf6   :  { %v584_v61 = vpop.f32.mrb[0].mxu1  ;;  %v168_v62 = vpop.f32.mrb[1].mxu0 }
  0xf7   :  { %v370_v63 = vpop.f32.mrb[1].mxu1  ;;  %v565_v0 = vpop.f32.mrb[2].mxu0 }
  0xf8   :  { %v184_v1 = vpack.c.bf16 %v565_v0, %v564_v60  ;;  %v585_v2 = vpop.f32.mrb[2].mxu1  ;;  %v171_v3 = vpop.f32.mrb[3].mxu0 }
  0xf9   :  { %v386_v4 = vpack.c.bf16 %v585_v2, %v584_v61  ;;  %v183_v5 = vpack.c.bf16 %v171_v3, %v168_v62  ;;  %v373_v6 = vpop.f32.mrb[3].mxu1 }
  0xfa   :  { %523 = vst [vmem:[%s760_s8 + $0x8] sm:$0xff] %v184_v1   ;;  %v385_v7 = vpack.c.bf16 %v373_v6, %v370_v63  ;;  %v205_v8 = vunpack.c.l.bf16 %v184_v1  ;;  %v206_v14 = vunpack.c.h.bf16 %v184_v1 }
  0xfb   :  { %525 = vst [vmem:[%s761_s9 + $0x8] sm:$0xff] %v386_v4   ;;  %498 = vst [vmem:[%s760_s8] sm:$0xff] %v183_v5   ;;  %v203_v9 = vunpack.c.l.bf16 %v183_v5  ;;  %v204_v10 = vunpack.c.h.bf16 %v183_v5  ;;  %v407_v11 = vunpack.c.l.bf16 %v386_v4  ;;  %v408_v15 = vunpack.c.h.bf16 %v386_v4 }
  0xfc   :  { %516 = vst [vmem:[%s761_s9] sm:$0xff] %v385_v7   ;;  %v405_v12 = vunpack.c.l.bf16 %v385_v7  ;;  %v406_v13 = vunpack.c.h.bf16 %v385_v7  ;;  %v218_v22 = vmul.f32 %v205_v8, %v205_v8  ;;  %v219_v28 = vmul.f32 %v206_v14, %v206_v14 }
  0xfd   :  { %v207_v16 = vadd.f32 %v204_v10, %v203_v9  ;;  %v216_v17 = vmul.f32 %v203_v9, %v203_v9  ;;  %v217_v18 = vmul.f32 %v204_v10, %v204_v10  ;;  %v420_v24 = vmul.f32 %v407_v11, %v407_v11 }
  0xfe   :  { %v409_v19 = vadd.f32 %v406_v13, %v405_v12  ;;  %v418_v20 = vmul.f32 %v405_v12, %v405_v12  ;;  %v419_v21 = vmul.f32 %v406_v13, %v406_v13  ;;  %v421_v30 = vmul.f32 %v408_v15, %v408_v15 }
  0xff   :  { %v208_v23 = vadd.f32 %v207_v16, %v205_v8  ;;  %v220_v25 = vadd.f32 %v217_v18, %v216_v17 }
 0x100   :  { %v410_v26 = vadd.f32 %v409_v19, %v407_v11  ;;  %v422_v27 = vadd.f32 %v419_v21, %v418_v20 }
 0x101   :  { %v209_v29 = vadd.f32 %v208_v23, %v206_v14  ;;  %v221_v31 = vadd.f32 %v220_v25, %v218_v22 }
 0x102   :  { %v411_v32 = vadd.f32 %v410_v26, %v408_v15  ;;  %v423_v33 = vadd.f32 %v422_v27, %v420_v24 }
 0x103   :  { %v210_v34 = vrot.slane %v209_v29, 4  ;;  %v222_v35 = vadd.f32 %v221_v31, %v219_v28 }
 0x104   :  { %v412_v36 = vrot.slane %v411_v32, 4  ;;  %v424_v37 = vadd.f32 %v423_v33, %v421_v30 }
 0x105   :  { %v211_v38 = vadd.f32 %v210_v34, %v209_v29  ;;  %v223_v39 = vrot.slane %v222_v35, 4 }
 0x106   :  { %v413_v40 = vadd.f32 %v412_v36, %v411_v32  ;;  %v425_v41 = vrot.slane %v424_v37, 4 }
 0x107   :  { %v212_v42 = vrot.slane %v211_v38, 2  ;;  %v224_v44 = vadd.f32 %v223_v39, %v222_v35 }
 0x108   :  { %v414_v45 = vrot.slane %v413_v40, 2  ;;  %v426_v46 = vadd.f32 %v425_v41, %v424_v37 }
 0x109   :  { %v213_v47 = vadd.f32 %v212_v42, %v211_v38  ;;  %v225_v48 = vrot.slane %v224_v44, 2 }
 0x10a   :  { %v415_v49 = vadd.f32 %v414_v45, %v413_v40  ;;  %v427_v50 = vrot.slane %v426_v46, 2 }
 0x10b   :  { %v226_v52 = vadd.f32 %v225_v48, %v224_v44  ;;  %v214_v54 = vrot.slane %v213_v47, 1 }
 0x10c   :  { %v428_v53 = vadd.f32 %v427_v50, %v426_v46  ;;  %v416_v55 = vrot.slane %v415_v49, 1 }
 0x10d   :  { %v227_v56 = vrot.slane %v226_v52, 1  ;;  %v215_v60 = vadd.f32 %v214_v54, %v213_v47 }
 0x10e   :  { %v429_v57 = vrot.slane %v428_v53, 1  ;;  %v417_v61 = vadd.f32 %v416_v55, %v415_v49 }
 0x10f   :  { %v228_v58 = vadd.f32 %v227_v56, %v226_v52 }
 0x110   :  { %v430_v59 = vadd.f32 %v429_v57, %v428_v53 }
 0x111   :  { %v233_v62 = vsel %vm232_vm0, %v228_v58, 0.0 }
 0x112   :  { %v431_v63 = vsel %vm232_vm0, %v430_v59, 0.0  ;;  %v234_v0 = vsel %vm231_vm1, %v215_v60, %v233_v62 }
 0x113   :  { %v432_v1 = vsel %vm231_vm1, %v417_v61, %v431_v63  ;;  %235 = vst [vmem:[%s762_s10] sm:$0xff] %v234_v0 }
 0x114   :  { %433 = vst [vmem:[%s763_s11] sm:$0xff] %v432_v1 }

// kernel: face_recon_forward.10
= control target key start
LH: loop header
LB: loop body
LE: loop exit
PB: predicated region body
PF: predicated region fallthrough
CT: control target
= control target key end

     0   :  { %s1814_s3 = inlined_call_operand.vmem [shape: bf16[128,128], index: 3, kind: input, shape index: {}]   ;;  %s1815_s10 = inlined_call_operand.vmem [shape: bf16[128,128], index: 10, kind: input, shape index: {}]   ;;  %s1816_s0 = inlined_call_operand.vmem [shape: bf16[32,128], index: 0, kind: input, shape index: {}]   ;;  %s1817_s1 = inlined_call_operand.vmem [shape: f32[1,128], index: 1, kind: input, shape index: {}]   ;;  %s1818_s7 = inlined_call_operand.vmem [shape: bf16[32,128], index: 7, kind: input, shape index: {}]   ;;  %s1819_s2 = inlined_call_operand.vmem [shape: f32[1,128], index: 2, kind: input, shape index: {}]   ;;  %s1820_s8 = inlined_call_operand.vmem [shape: f32[1,128], index: 8, kind: input, shape index: {}]   ;;  %s1821_s9 = inlined_call_operand.vmem [shape: f32[1,128], index: 9, kind: input, shape index: {}]   ;;  %s1822_s6 = inlined_call_operand.vmem [shape: bf16[128,128], index: 6, kind: input, shape index: {}]   ;;  %s1823_s13 = inlined_call_operand.vmem [shape: bf16[128,128], index: 13, kind: input, shape index: {}]   ;;  %s1824_s5 = inlined_call_operand.vmem [shape: bf16[128,128], index: 5, kind: input, shape index: {}]   ;;  %s1825_s12 = inlined_call_operand.vmem [shape: bf16[128,128], index: 12, kind: input, shape index: {}]   ;;  %s1826_s4 = inlined_call_operand.vmem [shape: bf16[32,128], index: 4, kind: input, shape index: {}]   ;;  %s1827_s11 = inlined_call_operand.vmem [shape: bf16[32,128], index: 11, kind: input, shape index: {}]   ;;  %s1828_s14 = inlined_call_operand.vmem [shape: bf16[32,128], index: 14, kind: output, shape index: {0}]   ;;  %s1829_s18 = inlined_call_operand.vmem [shape: bf16[32,128], index: 18, kind: output, shape index: {4}]   ;;  %s1830_s15 = inlined_call_operand.vmem [shape: f32[1,8,128], index: 15, kind: output, shape index: {1}]   ;;  %s1831_s19 = inlined_call_operand.vmem [shape: f32[1,8,128], index: 19, kind: output, shape index: {5}]   ;;  %s1832_s16 = inlined_call_operand.vmem [shape: bf16[32,128], index: 16, kind: output, shape index: {2}]   ;;  %s1833_s20 = inlined_call_operand.vmem [shape: bf16[32,128], index: 20, kind: output, shape index: {6}]   ;;  %s1834_s17 = inlined_call_operand.vmem [shape: f32[1,8,128], index: 17, kind: output, shape index: {3}]   ;;  %s1835_s21 = inlined_call_operand.vmem [shape: f32[1,8,128], index: 21, kind: output, shape index: {7}]  }
   0x1   :  { %1840 = sst [smem:[#allocation2_spill]] %s1814_s3  ;;  %v1106_v24 = vld [vmem:[%s1820_s8] ss:$0 sm:$0xff]  ;;  %v1426_v62 = vld [vmem:[%s1822_s6 + $0x8] sm:$0xff]  }
   0x2   :  { %1841 = sst [smem:[#allocation3_spill]] %s1815_s10  ;;  %s1847_s26 = sld [smem:[#allocation2_spill]]  ;;  %v1107_v29 = vld [vmem:[%s1821_s9] ss:$0 sm:$0xff]  ;;  %v1427_v63 = vld [vmem:[%s1823_s13 + $0x8] sm:$0xff]  }
   0x3   :  { %1842 = sst [smem:[#allocation4_spill]] %s1816_s0  ;;  %v1424_v58 = vld [vmem:[%s1822_s6] sm:$0xff]  }
   0x4   :  { %1843 = sst [smem:[#allocation5_spill]] %s1817_s1  ;;  %s1849_s22 = sld [smem:[#allocation4_spill]]  ;;  %v1425_v59 = vld [vmem:[%s1823_s13] sm:$0xff]  }
   0x5   :  { %1844 = sst [smem:[#allocation6_spill]] %s1818_s7  ;;  %s1850_s25 = sld [smem:[#allocation5_spill]] }
   0x6   :  { %1845 = sst [smem:[#allocation7_spill]] %s1819_s2  ;;  %s1851_s3 = sld [smem:[#allocation6_spill]] }
   0x7   :  { %1846 = sst [smem:[#allocation8_spill]] %s1830_s15  ;;  %s1848_s15 = sld [smem:[#allocation3_spill]] }
   0x8   :  { %v1408_v0 = vld [vmem:[%s1847_s26] sm:$0xff]   ;;  %v1410_v2 = vld [vmem:[%s1847_s26 + $0x8] sm:$0xff]   ;;  %v1412_v4 = vld [vmem:[%s1847_s26 + $0x10] sm:$0xff]   ;;  %s1852_s23 = sld [smem:[#allocation7_spill]] }
   0x9   :  { %1280 = vmatprep.subr.bf16.mxu1 %v1408_v0  ;;  %v1414_v6 = vld [vmem:[%s1847_s26 + $0x18] sm:$0xff]   ;;  %v1416_v8 = vld [vmem:[%s1847_s26 + $0x20] sm:$0xff]   ;;  %v1418_v10 = vld [vmem:[%s1847_s26 + $0x28] sm:$0xff]  }
   0xa   :  { %1281 = vmatpush3.bf16.msra.mxu1 %v1408_v0  ;;  %v1159_v11 = vld [vmem:[%s1849_s22] sm:$0xff]   ;;  %v1214_v12 = vld [vmem:[%s1849_s22 + $0x8] sm:$0xff]   ;;  %v1420_v32 = vld [vmem:[%s1847_s26 + $0x30] sm:$0xff]  }
   0xb   :  { %1282 = vmatprep.subr.bf16.mxu1 %v1410_v2  ;;  %v1070_v13 = vld [vmem:[%s1850_s25] ss:$0 sm:$0xff]  ;;  %v1160_v15 = vunpack.c.l.bf16 %v1159_v11  ;;  %v1161_v16 = vunpack.c.h.bf16 %v1159_v11  ;;  %v1164_v19 = vunpack.c.l.bf16 %v1214_v12  ;;  %v1165_v20 = vunpack.c.h.bf16 %v1214_v12  ;;  %v1422_v47 = vld [vmem:[%s1847_s26 + $0x38] sm:$0xff]   ;;  %v1428_v0 = vld [vmem:[%s1822_s6 + $0x10] sm:$0xff]  }
   0xc   :  { %v1187_v17 = vld [vmem:[%s1851_s3] sm:$0xff]   ;;  %v1217_v18 = vld [vmem:[%s1851_s3 + $0x8] sm:$0xff]   ;;  %v1439_v11 = vld [vmem:[%s1823_s13 + $0x38] sm:$0xff]  }
   0xd   :  { %v1409_v1 = vld [vmem:[%s1848_s15] sm:$0xff]   ;;  %v1411_v3 = vld [vmem:[%s1848_s15 + $0x8] sm:$0xff]   ;;  %v1413_v5 = vld [vmem:[%s1848_s15 + $0x10] sm:$0xff]   ;;  %v1188_v22 = vunpack.c.l.bf16 %v1187_v17  ;;  %v1189_v23 = vunpack.c.h.bf16 %v1187_v17  ;;  %v1192_v25 = vunpack.c.l.bf16 %v1217_v18  ;;  %v1193_v26 = vunpack.c.h.bf16 %v1217_v18 }
   0xe   :  { %1340 = vmatprep.subr.bf16.mxu0 %v1409_v1  ;;  %1283 = vmatpush3.bf16.msra.mxu1 %v1410_v2  ;;  %v1415_v7 = vld [vmem:[%s1848_s15 + $0x18] sm:$0xff]   ;;  %v1417_v9 = vld [vmem:[%s1848_s15 + $0x20] sm:$0xff]   ;;  %v1419_v14 = vld [vmem:[%s1848_s15 + $0x28] sm:$0xff]   ;;  %v71_v27 = vmul.f32 %v1160_v15, %v1070_v13  ;;  %v72_v28 = vmul.f32 %v1161_v16, %v1070_v13  ;;  %v73_v30 = vmul.f32 %v1164_v19, %v1070_v13 }
   0xf   :  { %1341 = vmatpush3.bf16.msra.mxu0 %v1409_v1  ;;  %1284 = vmatprep.subr.bf16.mxu1 %v1412_v4  ;;  %v1071_v21 = vld [vmem:[%s1852_s23] ss:$0 sm:$0xff]  ;;  %v74_v31 = vmul.f32 %v1165_v20, %v1070_v13  ;;  %v564_v33 = vmul.f32 %v1188_v22, %v1106_v24  ;;  %v565_v34 = vmul.f32 %v1189_v23, %v1106_v24  ;;  %v1421_v36 = vld [vmem:[%s1848_s15 + $0x30] sm:$0xff]   ;;  %v1423_v51 = vld [vmem:[%s1848_s15 + $0x38] sm:$0xff]  }
  0x10   :  { %1342 = vmatprep.subr.bf16.mxu0 %v1411_v3  ;;  %v566_v35 = vmul.f32 %v1192_v25, %v1106_v24  ;;  %v82_v37 = vadd.f32 %v1071_v21, %v71_v27  ;;  %v83_v38 = vadd.f32 %v1071_v21, %v72_v28  ;;  %v84_v39 = vadd.f32 %v1071_v21, %v73_v30  ;;  %v1429_v1 = vld [vmem:[%s1823_s13 + $0x10] sm:$0xff]   ;;  %v1430_v2 = vld [vmem:[%s1822_s6 + $0x18] sm:$0xff]   ;;  %v1440_v12 = vld [vmem:[%s1824_s5] sm:$0xff]  }
  0x11   :  { %v575_v40 = vadd.f32 %v1107_v29, %v564_v33  ;;  %v576_v41 = vadd.f32 %v1107_v29, %v565_v34  ;;  %v85_v42 = vadd.f32 %v1071_v21, %v74_v31  ;;  %v567_v43 = vmul.f32 %v1193_v26, %v1106_v24  ;;  %v1441_v13 = vld [vmem:[%s1825_s12] sm:$0xff]   ;;  %v1443_v15 = vld [vmem:[%s1825_s12 + $0x8] sm:$0xff]   ;;  %v1444_v18 = vld [vmem:[%s1824_s5 + $0x10] sm:$0xff]  }
  0x12   :  { %1285 = vmatpush3.bf16.msra.mxu1 %v1412_v4  ;;  %v86_v44 = vmax.f32 %v82_v37, 0.0  ;;  %v87_v45 = vmax.f32 %v83_v38, 0.0  ;;  %v577_v46 = vadd.f32 %v1107_v29, %v566_v35  ;;  %v88_v54 = vmax.f32 %v84_v39, 0.0  ;;  %v1432_v4 = vld [vmem:[%s1822_s6 + $0x20] sm:$0xff]   ;;  %v1445_v19 = vld [vmem:[%s1825_s12 + $0x10] sm:$0xff]   ;;  %v1446_v20 = vld [vmem:[%s1824_s5 + $0x18] sm:$0xff]  }
  0x13   :  { %1343 = vmatpush3.bf16.msra.mxu0 %v1411_v3  ;;  %1286 = vmatprep.subr.bf16.mxu1 %v1414_v6  ;;  %v579_v48 = vmax.f32 %v575_v40, 0.0  ;;  %v580_v49 = vmax.f32 %v576_v41, 0.0  ;;  %v578_v50 = vadd.f32 %v1107_v29, %v567_v43  ;;  %v89_v55 = vmax.f32 %v85_v42, 0.0  ;;  %v1431_v3 = vld [vmem:[%s1823_s13 + $0x18] sm:$0xff]   ;;  %v1456_v16 = vld [vmem:[%s1826_s4] sm:$0xff]   ;;  %v1450_v24 = vld [vmem:[%s1824_s5 + $0x28] sm:$0xff]  }
  0x14   :  { %1344 = vmatprep.subr.bf16.mxu0 %v1413_v5  ;;  %v90_v52 = vpack.c.bf16 %v87_v45, %v86_v44  ;;  %v581_v56 = vmax.f32 %v577_v46, 0.0  ;;  %v1457_v17 = vld [vmem:[%s1827_s11] sm:$0xff]   ;;  %v1447_v21 = vld [vmem:[%s1825_s12 + $0x18] sm:$0xff]   ;;  %v1451_v25 = vld [vmem:[%s1825_s12 + $0x28] sm:$0xff]  }
  0x15   :  { %v583_v53 = vpack.c.bf16 %v580_v49, %v579_v48  ;;  %v582_v57 = vmax.f32 %v578_v50, 0.0  ;;  %v1648_v60 = vpack.c.bf16 %v89_v55, %v88_v54  ;;  %v1448_v22 = vld [vmem:[%s1824_s5 + $0x20] sm:$0xff]   ;;  %v1452_v26 = vld [vmem:[%s1824_s5 + $0x30] sm:$0xff]   ;;  %v1454_v28 = vld [vmem:[%s1824_s5 + $0x38] sm:$0xff]  }
  0x16   :  { %1287 = vmatpush3.bf16.msra.mxu1 %v1414_v6  ;;  %1296 = vmatprep.mubr.bf16.mxu1 %v90_v52  ;;  %v1434_v6 = vld [vmem:[%s1822_s6 + $0x28] sm:$0xff]   ;;  %v1449_v23 = vld [vmem:[%s1825_s12 + $0x20] sm:$0xff]   ;;  %v1453_v27 = vld [vmem:[%s1825_s12 + $0x30] sm:$0xff]  }
  0x17   :  { %1345 = vmatpush3.bf16.msra.mxu0 %v1413_v5  ;;  %1288 = vmatprep.subr.bf16.mxu1 %v1416_v8  ;;  %v1650_v61 = vpack.c.bf16 %v582_v57, %v581_v56  ;;  %v1433_v5 = vld [vmem:[%s1823_s13 + $0x20] sm:$0xff]   ;;  %v1455_v29 = vld [vmem:[%s1825_s12 + $0x38] sm:$0xff]   ;;  %v1458_v30 = vld [vmem:[%s1826_s4 + $0x8] sm:$0xff]  }
  0x18   :  { %1346 = vmatprep.subr.bf16.mxu0 %v1415_v7  ;;  %1356 = vmatprep.mubr.bf16.mxu0 %v583_v53  ;;  %v1459_v31 = vld [vmem:[%s1827_s11 + $0x8] sm:$0xff]  }
  0x1a   :  { %1289 = vmatpush3.bf16.msra.mxu1 %v1416_v8  ;;  %v1436_v8 = vld [vmem:[%s1822_s6 + $0x30] sm:$0xff]  }
  0x1b   :  { %1347 = vmatpush3.bf16.msra.mxu0 %v1415_v7  ;;  %1290 = vmatprep.subr.bf16.mxu1 %v1418_v10  ;;  %v1435_v7 = vld [vmem:[%s1823_s13 + $0x28] sm:$0xff]  }
  0x1c   :  { %1348 = vmatprep.subr.bf16.mxu0 %v1417_v9 }
  0x1e   :  { %1291 = vmatpush3.bf16.msra.mxu1 %v1418_v10  ;;  %v1438_v10 = vld [vmem:[%s1822_s6 + $0x38] sm:$0xff]   ;;  %s1853_s6 = sld [smem:[#allocation8_spill]] }
  0x1f   :  { %1349 = vmatpush3.bf16.msra.mxu0 %v1417_v9  ;;  %1292 = vmatprep.subr.bf16.mxu1 %v1420_v32  ;;  %v1437_v9 = vld [vmem:[%s1823_s13 + $0x30] sm:$0xff]  }
  0x20   :  { %1350 = vmatprep.subr.bf16.mxu0 %v1419_v14 }
  0x22   :  { %1293 = vmatpush3.bf16.msra.mxu1 %v1420_v32 }
  0x23   :  { %1351 = vmatpush3.bf16.msra.mxu0 %v1419_v14  ;;  %1294 = vmatprep.subr.bf16.mxu1 %v1422_v47  ;;  %v1442_v14 = vld [vmem:[%s1824_s5 + $0x8] sm:$0xff]  }
  0x24   :  { %1352 = vmatprep.subr.bf16.mxu0 %v1421_v36 }
  0x26   :  { %1295 = vmatpush3.bf16.msra.mxu1 %v1422_v47 }
  0x27   :  { %1353 = vmatpush3.bf16.msra.mxu0 %v1421_v36  ;;  %1300 = vmatprep.subr.bf16.mxu1 %v1424_v58 }
  0x28   :  { %1354 = vmatprep.subr.bf16.mxu0 %v1423_v51 }
  0x29   :  { %1297 = vmatmul.mubr.bf16.vlgmr.msra.gmra.mrb[0].mxu1 %v1648_v60 }
  0x2a   :  { %1301 = vmatpush3.bf16.msra.mxu1 %v1424_v58  ;;  %1316 = vmatprep.mubr.bf16.mxu1 %v90_v52 }
  0x2b   :  { %1355 = vmatpush3.bf16.msra.mxu0 %v1423_v51  ;;  %1302 = vmatprep.subr.bf16.mxu1 %v1426_v62 }
  0x2c   :  { %1360 = vmatprep.subr.bf16.mxu0 %v1425_v59 }
  0x2e   :  { %1357 = vmatmul.mubr.bf16.vlgmr.msra.gmra.mrb[0].mxu0 %v1650_v61  ;;  %1303 = vmatpush3.bf16.msra.mxu1 %v1426_v62 }
  0x2f   :  { %1361 = vmatpush3.bf16.msra.mxu0 %v1425_v59  ;;  %1376 = vmatprep.mubr.bf16.mxu0 %v583_v53 }
  0x30   :  { %1362 = vmatprep.subr.bf16.mxu0 %v1427_v63  ;;  %1304 = vmatprep.subr.bf16.mxu1 %v1428_v0 }
  0x32   :  { %1305 = vmatpush3.bf16.msra.mxu1 %v1428_v0 }
  0x33   :  { %1363 = vmatpush3.bf16.msra.mxu0 %v1427_v63  ;;  %1306 = vmatprep.subr.bf16.mxu1 %v1430_v2 }
  0x34   :  { %1364 = vmatprep.subr.bf16.mxu0 %v1429_v1 }
  0x36   :  { %1307 = vmatpush3.bf16.msra.mxu1 %v1430_v2 }
  0x37   :  { %1365 = vmatpush3.bf16.msra.mxu0 %v1429_v1  ;;  %1308 = vmatprep.subr.bf16.mxu1 %v1432_v4 }
  0x38   :  { %1366 = vmatprep.subr.bf16.mxu0 %v1431_v3 }
  0x3a   :  { %1309 = vmatpush3.bf16.msra.mxu1 %v1432_v4 }
  0x3b   :  { %1367 = vmatpush3.bf16.msra.mxu0 %v1431_v3  ;;  %1310 = vmatprep.subr.bf16.mxu1 %v1434_v6 }
  0x3c   :  { %1368 = vmatprep.subr.bf16.mxu0 %v1433_v5 }
  0x3e   :  { %1311 = vmatpush3.bf16.msra.mxu1 %v1434_v6 }
  0x3f   :  { %1369 = vmatpush3.bf16.msra.mxu0 %v1433_v5  ;;  %1312 = vmatprep.subr.bf16.mxu1 %v1436_v8 }
  0x40   :  { %1370 = vmatprep.subr.bf16.mxu0 %v1435_v7 }
  0x42   :  { %1313 = vmatpush3.bf16.msra.mxu1 %v1436_v8 }
  0x43   :  { %1371 = vmatpush3.bf16.msra.mxu0 %v1435_v7  ;;  %1314 = vmatprep.subr.bf16.mxu1 %v1438_v10 }
  0x44   :  { %1372 = vmatprep.subr.bf16.mxu0 %v1437_v9 }
  0x46   :  { %1315 = vmatpush3.bf16.msra.mxu1 %v1438_v10 }
  0x47   :  { %1373 = vmatpush3.bf16.msra.mxu0 %v1437_v9  ;;  %1320 = vmatprep.subr.bf16.mxu1 %v1440_v12 }
  0x48   :  { %1374 = vmatprep.subr.bf16.mxu0 %v1439_v11 }
  0x49   :  { %1317 = vmatmul.mubr.bf16.vlgmr.msra.gmra.mrb[4].mxu1 %v1648_v60 }
  0x4a   :  { %1321 = vmatpush3.bf16.msra.mxu1 %v1440_v12  ;;  %1336 = vmatprep.mubr.bf16.mxu1 %v1456_v16 }
  0x4b   :  { %1375 = vmatpush3.bf16.msra.mxu0 %v1439_v11  ;;  %1322 = vmatprep.subr.bf16.mxu1 %v1442_v14 }
  0x4c   :  { %1380 = vmatprep.subr.bf16.mxu0 %v1441_v13 }
  0x4e   :  { %1377 = vmatmul.mubr.bf16.vlgmr.msra.gmra.mrb[4].mxu0 %v1650_v61  ;;  %1323 = vmatpush3.bf16.msra.mxu1 %v1442_v14 }
  0x4f   :  { %1381 = vmatpush3.bf16.msra.mxu0 %v1441_v13  ;;  %1396 = vmatprep.mubr.bf16.mxu0 %v1457_v17 }
  0x50   :  { %1382 = vmatprep.subr.bf16.mxu0 %v1443_v15  ;;  %1324 = vmatprep.subr.bf16.mxu1 %v1444_v18 }
  0x52   :  { %1325 = vmatpush3.bf16.msra.mxu1 %v1444_v18 }
  0x53   :  { %1383 = vmatpush3.bf16.msra.mxu0 %v1443_v15  ;;  %1326 = vmatprep.subr.bf16.mxu1 %v1446_v20  ;;  %v251_v15 = vlaneseq }
  0x54   :  { %1384 = vmatprep.subr.bf16.mxu0 %v1445_v19 }
  0x56   :  { %1327 = vmatpush3.bf16.msra.mxu1 %v1446_v20 }
  0x57   :  { %1385 = vmatpush3.bf16.msra.mxu0 %v1445_v19  ;;  %1328 = vmatprep.subr.bf16.mxu1 %v1448_v22 }
  0x58   :  { %1386 = vmatprep.subr.bf16.mxu0 %v1447_v21 }
  0x5a   :  { %1329 = vmatpush3.bf16.msra.mxu1 %v1448_v22 }
  0x5b   :  { %1387 = vmatpush3.bf16.msra.mxu0 %v1447_v21  ;;  %1330 = vmatprep.subr.bf16.mxu1 %v1450_v24 }
  0x5c   :  { %1388 = vmatprep.subr.bf16.mxu0 %v1449_v23 }
  0x5e   :  { %1331 = vmatpush3.bf16.msra.mxu1 %v1450_v24 }
  0x5f   :  { %1389 = vmatpush3.bf16.msra.mxu0 %v1449_v23  ;;  %1332 = vmatprep.subr.bf16.mxu1 %v1452_v26  ;;  %v1770_v23 = vshrl.u32 %v251_v15, 7 }
  0x60   :  { %1390 = vmatprep.subr.bf16.mxu0 %v1451_v25 }
  0x61   :  { %vm254_vm0 = vcmp.eq.s32.totalorder %v1770_v23, 1  ;;  %vm253_vm1 = vcmp.eq.s32.totalorder %v1770_v23, 0 }
  0x62   :  { %1333 = vmatpush3.bf16.msra.mxu1 %v1452_v26 }
  0x63   :  { %1391 = vmatpush3.bf16.msra.mxu0 %v1451_v25  ;;  %1334 = vmatprep.subr.bf16.mxu1 %v1454_v28 }
  0x64   :  { %1392 = vmatprep.subr.bf16.mxu0 %v1453_v27 }
  0x66   :  { %1335 = vmatpush3.bf16.msra.mxu1 %v1454_v28 }
  0x67   :  { %1393 = vmatpush3.bf16.msra.mxu0 %v1453_v27 }
  0x68   :  { %1394 = vmatprep.subr.bf16.mxu0 %v1455_v29 }
  0x69   :  { %1337 = vmatmul.mubr.bf16.vlgmr.msra.gmra.mrb[4].mxu1 %v1458_v30 }
  0x6b   :  { %1395 = vmatpush3.bf16.msra.mxu0 %v1455_v29 }
  0x6e   :  { %1397 = vmatmul.mubr.bf16.vlgmr.msra.gmra.mrb[4].mxu0 %v1459_v31 }
  0xfc   :  { %v1298_v32 = vpop.f32.mrb[0].mxu1 }
  0xfd   :  { %v190_v34 = vpop.f32.mrb[1].mxu1 }
  0xfe   :  { %v1299_v36 = vpop.f32.mrb[2].mxu1 }
  0xff   :  { %v206_v37 = vpack.c.bf16 %v1299_v36, %v1298_v32  ;;  %v193_v39 = vpop.f32.mrb[3].mxu1 }
 0x100   :  { %v205_v41 = vpack.c.bf16 %v193_v39, %v190_v34 }
 0x101   :  { %v1358_v33 = vpop.f32.mrb[0].mxu0  ;;  %1215 = vst [vmem:[%s1828_s14 + $0x8] sm:$0xff] %v206_v37   ;;  %v227_v44 = vunpack.c.l.bf16 %v206_v37  ;;  %v228_v50 = vunpack.c.h.bf16 %v206_v37 }
 0x102   :  { %v683_v35 = vpop.f32.mrb[1].mxu0  ;;  %1170 = vst [vmem:[%s1828_s14] sm:$0xff] %v205_v41   ;;  %v225_v45 = vunpack.c.l.bf16 %v205_v41  ;;  %v226_v46 = vunpack.c.h.bf16 %v205_v41 }
 0x103   :  { %v1359_v38 = vpop.f32.mrb[2].mxu0  ;;  %v240_v58 = vmul.f32 %v227_v44, %v227_v44  ;;  %v241_v0 = vmul.f32 %v228_v50, %v228_v50 }
 0x104   :  { %v699_v40 = vpack.c.bf16 %v1359_v38, %v1358_v33  ;;  %v686_v42 = vpop.f32.mrb[3].mxu0  ;;  %v229_v52 = vadd.f32 %v226_v46, %v225_v45  ;;  %v238_v53 = vmul.f32 %v225_v45, %v225_v45  ;;  %v239_v54 = vmul.f32 %v226_v46, %v226_v46 }
 0x105   :  { %v698_v43 = vpack.c.bf16 %v686_v42, %v683_v35 }
 0x106   :  { %1218 = vst [vmem:[%s1829_s18 + $0x8] sm:$0xff] %v699_v40   ;;  %v720_v47 = vunpack.c.l.bf16 %v699_v40  ;;  %v721_v51 = vunpack.c.h.bf16 %v699_v40  ;;  %v230_v59 = vadd.f32 %v229_v52, %v227_v44  ;;  %v242_v61 = vadd.f32 %v239_v54, %v238_v53 }
 0x107   :  { %1198 = vst [vmem:[%s1829_s18] sm:$0xff] %v698_v43   ;;  %v718_v48 = vunpack.c.l.bf16 %v698_v43  ;;  %v719_v49 = vunpack.c.h.bf16 %v698_v43 }
 0x108   :  { %v733_v60 = vmul.f32 %v720_v47, %v720_v47  ;;  %v231_v1 = vadd.f32 %v230_v59, %v228_v50  ;;  %v734_v2 = vmul.f32 %v721_v51, %v721_v51  ;;  %v243_v3 = vadd.f32 %v242_v61, %v240_v58 }
 0x109   :  { %v722_v55 = vadd.f32 %v719_v49, %v718_v48  ;;  %v731_v56 = vmul.f32 %v718_v48, %v718_v48  ;;  %v732_v57 = vmul.f32 %v719_v49, %v719_v49 }
 0x10a   :  { %v232_v6 = vrot.slane %v231_v1, 4  ;;  %v244_v7 = vadd.f32 %v243_v3, %v241_v0 }
 0x10b   :  { %v723_v62 = vadd.f32 %v722_v55, %v720_v47  ;;  %v735_v63 = vadd.f32 %v732_v57, %v731_v56 }
 0x10c   :  { %v233_v10 = vadd.f32 %v232_v6, %v231_v1  ;;  %v245_v11 = vrot.slane %v244_v7, 4 }
 0x10d   :  { %v724_v4 = vadd.f32 %v723_v62, %v721_v51  ;;  %v736_v5 = vadd.f32 %v735_v63, %v733_v60 }
 0x10e   :  { %v234_v14 = vrot.slane %v233_v10, 2  ;;  %v246_v16 = vadd.f32 %v245_v11, %v244_v7 }
 0x10f   :  { %v725_v8 = vrot.slane %v724_v4, 4  ;;  %v737_v9 = vadd.f32 %v736_v5, %v734_v2 }
 0x110   :  { %v235_v19 = vadd.f32 %v234_v14, %v233_v10  ;;  %v247_v20 = vrot.slane %v246_v16, 2 }
 0x111   :  { %v726_v12 = vadd.f32 %v725_v8, %v724_v4  ;;  %v738_v13 = vrot.slane %v737_v9, 4 }
 0x112   :  { %v248_v24 = vadd.f32 %v247_v20, %v246_v16  ;;  %v236_v26 = vrot.slane %v235_v19, 1 }
 0x113   :  { %v727_v17 = vrot.slane %v726_v12, 2  ;;  %v739_v18 = vadd.f32 %v738_v13, %v737_v9 }
 0x114   :  { %v249_v28 = vrot.slane %v248_v24, 1  ;;  %v237_v32 = vadd.f32 %v236_v26, %v235_v19 }
 0x115   :  { %v728_v21 = vadd.f32 %v727_v17, %v726_v12  ;;  %v740_v22 = vrot.slane %v739_v18, 2 }
 0x116   :  { %v250_v30 = vadd.f32 %v249_v28, %v248_v24 }
 0x117   :  { %v741_v25 = vadd.f32 %v740_v22, %v739_v18  ;;  %v729_v27 = vrot.slane %v728_v21, 1 }
 0x118   :  { %v255_v34 = vsel %vm254_vm0, %v250_v30, 0.0 }
 0x119   :  { %v742_v29 = vrot.slane %v741_v25, 1  ;;  %v730_v33 = vadd.f32 %v729_v27, %v728_v21  ;;  %v256_v36 = vsel %vm253_vm1, %v237_v32, %v255_v34 }
 0x11a   :  { %257 = vst [vmem:[%s1853_s6] sm:$0xff] %v256_v36 }
 0x11b   :  { %v743_v31 = vadd.f32 %v742_v29, %v741_v25 }
 0x11d   :  { %v744_v35 = vsel %vm254_vm0, %v743_v31, 0.0 }
 0x11e   :  { %v745_v37 = vsel %vm253_vm1, %v730_v33, %v744_v35 }
 0x11f   :  { %746 = vst [vmem:[%s1831_s19] sm:$0xff] %v745_v37 }
 0x13c   :  { %v1338_v38 = vpop.f32.mrb[4].mxu1 }
 0x13d   :  { %v485_v40 = vpop.f32.mrb[5].mxu1 }
 0x13e   :  { %v1339_v42 = vpop.f32.mrb[6].mxu1 }
 0x13f   :  { %v501_v43 = vpack.c.bf16 %v1339_v42, %v1338_v38  ;;  %v488_v45 = vpop.f32.mrb[7].mxu1 }
 0x140   :  { %v500_v47 = vpack.c.bf16 %v488_v45, %v485_v40 }
 0x141   :  { %v1398_v39 = vpop.f32.mrb[4].mxu0  ;;  %1216 = vst [vmem:[%s1832_s16 + $0x8] sm:$0xff] %v501_v43   ;;  %v522_v50 = vunpack.c.l.bf16 %v501_v43  ;;  %v523_v56 = vunpack.c.h.bf16 %v501_v43 }
 0x142   :  { %v974_v41 = vpop.f32.mrb[5].mxu0  ;;  %1180 = vst [vmem:[%s1832_s16] sm:$0xff] %v500_v47   ;;  %v520_v51 = vunpack.c.l.bf16 %v500_v47  ;;  %v521_v52 = vunpack.c.h.bf16 %v500_v47 }
 0x143   :  { %v1399_v44 = vpop.f32.mrb[6].mxu0  ;;  %v535_v0 = vmul.f32 %v522_v50, %v522_v50  ;;  %v536_v6 = vmul.f32 %v523_v56, %v523_v56 }
 0x144   :  { %v990_v46 = vpack.c.bf16 %v1399_v44, %v1398_v39  ;;  %v977_v48 = vpop.f32.mrb[7].mxu0  ;;  %v524_v58 = vadd.f32 %v521_v52, %v520_v51  ;;  %v533_v59 = vmul.f32 %v520_v51, %v520_v51  ;;  %v534_v60 = vmul.f32 %v521_v52, %v521_v52 }
 0x145   :  { %v989_v49 = vpack.c.bf16 %v977_v48, %v974_v41 }
 0x146   :  { %1219 = vst [vmem:[%s1833_s20 + $0x8] sm:$0xff] %v990_v46   ;;  %v1011_v53 = vunpack.c.l.bf16 %v990_v46  ;;  %v1012_v57 = vunpack.c.h.bf16 %v990_v46  ;;  %v525_v1 = vadd.f32 %v524_v58, %v522_v50  ;;  %v537_v3 = vadd.f32 %v534_v60, %v533_v59 }
 0x147   :  { %1208 = vst [vmem:[%s1833_s20] sm:$0xff] %v989_v49   ;;  %v1009_v54 = vunpack.c.l.bf16 %v989_v49  ;;  %v1010_v55 = vunpack.c.h.bf16 %v989_v49 }
 0x148   :  { %v1024_v2 = vmul.f32 %v1011_v53, %v1011_v53  ;;  %v526_v7 = vadd.f32 %v525_v1, %v523_v56  ;;  %v1025_v8 = vmul.f32 %v1012_v57, %v1012_v57  ;;  %v538_v9 = vadd.f32 %v537_v3, %v535_v0 }
 0x149   :  { %v1013_v61 = vadd.f32 %v1010_v55, %v1009_v54  ;;  %v1022_v62 = vmul.f32 %v1009_v54, %v1009_v54  ;;  %v1023_v63 = vmul.f32 %v1010_v55, %v1010_v55 }
 0x14a   :  { %v527_v12 = vrot.slane %v526_v7, 4  ;;  %v539_v13 = vadd.f32 %v538_v9, %v536_v6 }
 0x14b   :  { %v1014_v4 = vadd.f32 %v1013_v61, %v1011_v53  ;;  %v1026_v5 = vadd.f32 %v1023_v63, %v1022_v62 }
 0x14c   :  { %v528_v16 = vadd.f32 %v527_v12, %v526_v7  ;;  %v540_v17 = vrot.slane %v539_v13, 4 }
 0x14d   :  { %v1015_v10 = vadd.f32 %v1014_v4, %v1012_v57  ;;  %v1027_v11 = vadd.f32 %v1026_v5, %v1024_v2 }
 0x14e   :  { %v529_v20 = vrot.slane %v528_v16, 2  ;;  %v541_v21 = vadd.f32 %v540_v17, %v539_v13 }
 0x14f   :  { %v1016_v14 = vrot.slane %v1015_v10, 4  ;;  %v1028_v15 = vadd.f32 %v1027_v11, %v1025_v8 }
 0x150   :  { %v530_v25 = vadd.f32 %v529_v20, %v528_v16  ;;  %v542_v26 = vrot.slane %v541_v21, 2 }
 0x151   :  { %v1017_v18 = vadd.f32 %v1016_v14, %v1015_v10  ;;  %v1029_v19 = vrot.slane %v1028_v15, 4 }
 0x152   :  { %v543_v29 = vadd.f32 %v542_v26, %v541_v21  ;;  %v531_v31 = vrot.slane %v530_v25, 1 }
 0x153   :  { %v1018_v22 = vrot.slane %v1017_v18, 2  ;;  %v1030_v24 = vadd.f32 %v1029_v19, %v1028_v15 }
 0x154   :  { %v544_v33 = vrot.slane %v543_v29, 1  ;;  %v532_v37 = vadd.f32 %v531_v31, %v530_v25 }
 0x155   :  { %v1019_v27 = vadd.f32 %v1018_v22, %v1017_v18  ;;  %v1031_v28 = vrot.slane %v1030_v24, 2 }
 0x156   :  { %v545_v35 = vadd.f32 %v544_v33, %v543_v29 }
 0x157   :  { %v1032_v30 = vadd.f32 %v1031_v28, %v1030_v24  ;;  %v1020_v32 = vrot.slane %v1019_v27, 1 }
 0x158   :  { %v546_v39 = vsel %vm254_vm0, %v545_v35, 0.0 }
 0x159   :  { %v1033_v34 = vrot.slane %v1032_v30, 1  ;;  %v1021_v38 = vadd.f32 %v1020_v32, %v1019_v27  ;;  %v547_v41 = vsel %vm253_vm1, %v532_v37, %v546_v39 }
 0x15a   :  { %548 = vst [vmem:[%s1834_s17] sm:$0xff] %v547_v41 }
 0x15b   :  { %v1034_v36 = vadd.f32 %v1033_v34, %v1032_v30 }
 0x15d   :  { %v1035_v40 = vsel %vm254_vm0, %v1034_v36, 0.0 }
 0x15e   :  { %v1036_v42 = vsel %vm253_vm1, %v1021_v38, %v1035_v40 }
 0x15f   :  { %1037 = vst [vmem:[%s1835_s21] sm:$0xff] %v1036_v42 }

</bundles_post_ra>
